<compile_context>
chip_gen: v7x
topology: tpu7x:2x2x1
jax: 0.10.0
libtpu: 0.0.40
codegen_flags: <defaults>
</compile_context>

<pallas_src>
import functools
import math

import jax
import jax.numpy as jnp
from jax.experimental import pallas as pl
from jax.experimental.pallas import tpu as pltpu


D_HIDDEN = 288  # hard-coded in the PyTorch module (branches consume 288 ch)


# ------------------------------ fused kernel --------------------------------

def _adapter_kernel(x_ref, fc1_w_ref, fc1_b_ref,
                    b1_w_ref, b1_b_ref,
                    b2a_w_ref, b2a_b_ref,
                    w3_ref, b3_ref,
                    fc2_w_ref, fc2_wa_ref, fc2_wb_ref, fc2_b_ref,
                    o_ref,
                    pad_ref,
                    *, W, H, skip_connect, compute_dtype):
    """Full MulConvAdapter forward for one batch element per grid step."""
    cd = compute_dtype
    WH = W * H
    cred = b2a_w_ref.shape[1]

    x_in = x_ref[0]                                            # (P, Cin) f32

    # ---- D_fc1 + ReLU -------------------------------------------------------
    x0 = jnp.dot(x_in.astype(cd), fc1_w_ref[...].astype(cd),
                 preferred_element_type=jnp.float32) + fc1_b_ref[...]
    x0 = jnp.maximum(x0, 0.0)                                  # (P, 288) f32

    xs = x0[1:, :]                                             # (WH, 288) spatial tokens

    # ---- branch1: 1x1 conv + folded BN + ReLU (per-pixel matmul) ------------
    br1 = jnp.maximum(
        jnp.dot(xs.astype(cd), b1_w_ref[...].astype(cd),
                preferred_element_type=jnp.float32) + b1_b_ref[...], 0.0)

    # ---- branch2[0]: 1x1 conv + folded BN + ReLU -----------------------------
    br2a = jnp.maximum(
        jnp.dot(xs.astype(cd), b2a_w_ref[...].astype(cd),
                preferred_element_type=jnp.float32) + b2a_b_ref[...], 0.0)

    # ---- branch2[1]: 3x3 conv (pad=1) + folded BN + ReLU ---------------------
    # In-kernel halo pad into a VMEM scratch, then ONE K = 9*cred im2col matmul
    # (fills the MXU instead of nine K=32 contractions).
    pad_ref[...] = jnp.zeros_like(pad_ref)
    pad_ref[1:W + 1, 1:H + 1, :] = br2a.reshape(W, H, cred)
    cols = jnp.concatenate(
        [pad_ref[dy:dy + W, dx:dx + H, :].reshape(WH, cred)
         for dy in range(3) for dx in range(3)], axis=-1)      # (WH, 9*cred)
    br2 = jnp.maximum(
        jnp.dot(cols.astype(cd), w3_ref[...].astype(cd),
                preferred_element_type=jnp.float32) + b3_ref[...], 0.0)

    # ---- residual + D_fc2 with K split (no 288-ch concat materialized) ------
    base = jnp.dot(x0.astype(cd), fc2_w_ref[...].astype(cd),
                   preferred_element_type=jnp.float32)          # (P, Cin)
    tok = (jnp.dot(br1.astype(cd), fc2_wa_ref[...].astype(cd),
                   preferred_element_type=jnp.float32)
           + jnp.dot(br2.astype(cd), fc2_wb_ref[...].astype(cd),
                     preferred_element_type=jnp.float32))       # (WH, Cin)

    out_cls = 2.0 * base[0:1, :] + fc2_b_ref[...]   # (cls + x0_cls) @ W2 + b
    out_tok = base[1:, :] + tok + fc2_b_ref[...]    # (tokens + x0) @ W2 + b
    if skip_connect:
        out_cls = out_cls + x_in[0:1, :]
        out_tok = out_tok + x_in[1:, :]
    out = jnp.concatenate([out_cls, out_tok], axis=0)           # (P, Cin)
    o_ref[0] = out.astype(o_ref.dtype)


# ------------------------------ wrapper --------------------------------------

def mul_conv_adapter(x, params, skip_connect=False, compute_dtype=jnp.float32):
    """Fused Pallas forward of MulConvAdapter.  x: (B, P, fc_in), P = W*H + 1."""
    B, P, Cin = x.shape
    WH = P - 1
    W = H = int(math.sqrt(WH))
    assert W * H == WH, "token grid must be square (P = W*H + 1)"
    D = D_HIDDEN
    ch1x1 = params["b1_w"].shape[1]
    cred = params["b2a_w"].shape[1]
    ch3x3 = params["b2b_w"].shape[-1]
    assert ch1x1 + ch3x3 == D, "channel concat must reproduce D=288"

    # Layout plumbing (free, outside the kernel): HWIO 3x3 weight -> (9*I, O)
    # im2col weight; D_fc2 weight pre-split along K for the concat-free fc2.
    w3_flat = params["b2b_w"].reshape(9 * cred, ch3x3)
    fc2_wa = params["fc2_w"][:ch1x1]
    fc2_wb = params["fc2_w"][ch1x1:]

    kernel = functools.partial(_adapter_kernel, W=W, H=H,
                               skip_connect=skip_connect,
                               compute_dtype=compute_dtype)

    def _full(shape):
        zeros = (0,) * len(shape)
        return pl.BlockSpec(shape, lambda b: zeros)

    return pl.pallas_call(
        kernel,
        out_shape=jax.ShapeDtypeStruct((B, P, Cin), x.dtype),
        grid=(B,),
        in_specs=[
            pl.BlockSpec((1, P, Cin), lambda b: (b, 0, 0)),      # x
            _full((Cin, D)), _full((1, D)),                      # D_fc1
            _full((D, ch1x1)), _full((1, ch1x1)),                # branch1 1x1
            _full((D, cred)), _full((1, cred)),                  # branch2 1x1
            _full((9 * cred, ch3x3)), _full((1, ch3x3)),         # branch2 3x3 (im2col)
            _full((D, Cin)), _full((ch1x1, Cin)),                # D_fc2 full + K split
            _full((ch3x3, Cin)), _full((1, Cin)),
        ],
        out_specs=pl.BlockSpec((1, P, Cin), lambda b: (b, 0, 0)),
        scratch_shapes=[pltpu.VMEM((W + 2, H + 2, cred), jnp.float32)],
        compiler_params=pltpu.CompilerParams(
            dimension_semantics=("parallel",)),
    )(x,
      params["fc1_w"], params["fc1_b"].reshape(1, D),
      params["b1_w"], params["b1_b"].reshape(1, ch1x1),
      params["b2a_w"], params["b2a_b"].reshape(1, cred),
      w3_flat, params["b2b_b"].reshape(1, ch3x3),
      params["fc2_w"], fc2_wa, fc2_wb, params["fc2_b"].reshape(1, Cin))


# ------------------------------ parameters -----------------------------------

def _fold_bn(w, b, gamma, beta, mean, var, eps=1e-3):
    """Fold eval-mode BatchNorm into conv weight (out-ch on last axis) / bias."""
    s = gamma / jnp.sqrt(var + eps)
    return w * s, b * s + (beta - mean * s)


def init_params(key, fc_in, ch1x1, ch3x3red, ch3x3):
    assert ch1x1 + ch3x3 == D_HIDDEN, "channel concat must give back D=288"
    ks = jax.random.split(key, 24)
    n = lambda k, shape, s=0.05: s * jax.random.normal(k, shape, jnp.float32)

    p = {}
    p["fc1_w"] = n(ks[0], (fc_in, D_HIDDEN))
    p["fc1_b"] = n(ks[1], (D_HIDDEN,))
    p["fc2_w"] = n(ks[2], (D_HIDDEN, fc_in))
    p["fc2_b"] = n(ks[3], (fc_in,))

    def bn(k0, k1, k2, k3, c):
        return (1.0 + n(ks[k0], (c,)),                                   # gamma
                n(ks[k1], (c,)),                                          # beta
                n(ks[k2], (c,)),                                          # running_mean
                1.0 + 0.1 * jnp.abs(jax.random.normal(ks[k3], (c,))))     # running_var

    # branch1: 1x1 conv 288 -> ch1x1 (+BN folded), weight as (in, out)
    p["b1_w"], p["b1_b"] = _fold_bn(n(ks[4], (D_HIDDEN, ch1x1)), n(ks[5], (ch1x1,)),
                                    *bn(6, 7, 8, 9, ch1x1))
    # branch2[0]: 1x1 conv 288 -> ch3x3red (+BN folded)
    p["b2a_w"], p["b2a_b"] = _fold_bn(n(ks[10], (D_HIDDEN, ch3x3red)),
                                      n(ks[11], (ch3x3red,)),
                                      *bn(12, 13, 14, 15, ch3x3red))
    # branch2[1]: 3x3 conv ch3x3red -> ch3x3, padding=1 (+BN folded), HWIO layout
    p["b2b_w"], p["b2b_b"] = _fold_bn(n(ks[16], (3, 3, ch3x3red, ch3x3)),
                                      n(ks[17], (ch3x3,)),
                                      *bn(18, 19, 20, 21, ch3x3))
    return p


# ------------------------------ pure-JAX reference ---------------------------

def mul_conv_adapter_reference(x, params, skip_connect=False):
    B, P, Cin = x.shape
    W = H = int(math.sqrt(P - 1))
    D = D_HIDDEN
    x0 = jax.nn.relu(x @ params["fc1_w"] + params["fc1_b"])
    xs = x0[:, 1:, :].reshape(B, W, H, D)
    br1 = jax.nn.relu(xs @ params["b1_w"] + params["b1_b"])
    br2a = jax.nn.relu(xs @ params["b2a_w"] + params["b2a_b"])
    xp = jnp.pad(br2a, ((0, 0), (1, 1), (1, 1), (0, 0)))
    acc = params["b2b_b"]
    for dy in range(3):
        for dx in range(3):
            acc = acc + xp[:, dy:dy + W, dx:dx + H, :] @ params["b2b_w"][dy, dx]
    br2 = jax.nn.relu(acc)
    cat = jnp.concatenate([br1, br2], axis=-1).reshape(B, W * H, D)
    outputs = jnp.concatenate([x0[:, 0:1, :], cat], axis=1) + x0
    out = outputs @ params["fc2_w"] + params["fc2_b"]
    if skip_connect:
        out = out + x
    return out


# ---------------------------------- main --------------------------------------

if __name__ == "__main__":
    B = 2
    fc_in_channels = 32          # token hidden dim
    W = H = 4
    P = W * H + 1                # 17 tokens (cls + 4x4 patches)
    ch1x1, ch3x3red, ch3x3 = 160, 32, 128   # 160 + 128 == 288

    key = jax.random.PRNGKey(0)
    kx, kp = jax.random.split(key)
    x = 0.1 * jax.random.normal(kx, (B, P, fc_in_channels), jnp.float32)
    params = init_params(kp, fc_in_channels, ch1x1, ch3x3red, ch3x3)

    out = mul_conv_adapter(x, params, skip_connect=False)
    out = jax.block_until_ready(out)
    assert out.shape == (B, P, fc_in_channels), out.shape
    assert bool(jnp.all(jnp.isfinite(out)))

    # Correctness check against a pure-JAX reference (loose tolerance: the
    # XLA default f32 matmul precision on TPU may differ slightly from the
    # in-kernel MXU accumulation).
    ref = mul_conv_adapter_reference(x, params, skip_connect=False)
    max_err = float(jnp.max(jnp.abs(out - ref)))
    assert max_err < 2e-2, f"mismatch vs reference: max |err| = {max_err}"

    print("KERNEL_OK")
</pallas_src>

<mosaic_0001>
module attributes {stable_mosaic.version = 11 : i64} {
  func.func @_adapter_kernel(%arg0: i32, %arg1: memref<1x17x32xf32, #tpu.memory_space<vmem>>, %arg2: memref<32x288xf32, #tpu.memory_space<vmem>>, %arg3: memref<1x288xf32, #tpu.memory_space<vmem>>, %arg4: memref<288x160xf32, #tpu.memory_space<vmem>>, %arg5: memref<1x160xf32, #tpu.memory_space<vmem>>, %arg6: memref<288x32xf32, #tpu.memory_space<vmem>>, %arg7: memref<1x32xf32, #tpu.memory_space<vmem>>, %arg8: memref<288x128xf32, #tpu.memory_space<vmem>>, %arg9: memref<1x128xf32, #tpu.memory_space<vmem>>, %arg10: memref<288x32xf32, #tpu.memory_space<vmem>>, %arg11: memref<160x32xf32, #tpu.memory_space<vmem>>, %arg12: memref<128x32xf32, #tpu.memory_space<vmem>>, %arg13: memref<1x32xf32, #tpu.memory_space<vmem>>, %arg14: memref<1x17x32xf32, #tpu.memory_space<vmem>>, %arg15: memref<6x6x32xf32, #tpu.memory_space<vmem>>) attributes {dimension_semantics = [#tpu.dimension_semantics<parallel>], iteration_bounds = array<i64: 2>, scalar_prefetch = 0 : i64, scratch_operands = 1 : i64, tpu.core_type = #tpu.core_type<tc>, window_params = [{transform_indices = @transform_0, window_bounds = array<i64: 1, 17, 32>}, {pipeline_mode = #tpu.pipeline_mode<synchronous>, transform_indices = @transform_1, window_bounds = array<i64: 32, 288>}, {pipeline_mode = #tpu.pipeline_mode<synchronous>, transform_indices = @transform_2, window_bounds = array<i64: 1, 288>}, {pipeline_mode = #tpu.pipeline_mode<synchronous>, transform_indices = @transform_3, window_bounds = array<i64: 288, 160>}, {pipeline_mode = #tpu.pipeline_mode<synchronous>, transform_indices = @transform_4, window_bounds = array<i64: 1, 160>}, {pipeline_mode = #tpu.pipeline_mode<synchronous>, transform_indices = @transform_5, window_bounds = array<i64: 288, 32>}, {pipeline_mode = #tpu.pipeline_mode<synchronous>, transform_indices = @transform_6, window_bounds = array<i64: 1, 32>}, {pipeline_mode = #tpu.pipeline_mode<synchronous>, transform_indices = @transform_7, window_bounds = array<i64: 288, 128>}, {pipeline_mode = #tpu.pipeline_mode<synchronous>, transform_indices = @transform_8, window_bounds = array<i64: 1, 128>}, {pipeline_mode = #tpu.pipeline_mode<synchronous>, transform_indices = @transform_9, window_bounds = array<i64: 288, 32>}, {pipeline_mode = #tpu.pipeline_mode<synchronous>, transform_indices = @transform_10, window_bounds = array<i64: 160, 32>}, {pipeline_mode = #tpu.pipeline_mode<synchronous>, transform_indices = @transform_11, window_bounds = array<i64: 128, 32>}, {pipeline_mode = #tpu.pipeline_mode<synchronous>, transform_indices = @transform_12, window_bounds = array<i64: 1, 32>}, {transform_indices = @transform_13, window_bounds = array<i64: 1, 17, 32>}]} {
    %c0 = arith.constant 0 : index
    %c0_0 = arith.constant 0 : index
    %c0_1 = arith.constant 0 : index
    %0 = vector.load %arg1[%c0, %c0_0, %c0_1] : memref<1x17x32xf32, #tpu.memory_space<vmem>>, vector<1x17x32xf32>
    %1 = vector.shape_cast %0 : vector<1x17x32xf32> to vector<17x32xf32>
    %c0_2 = arith.constant 0 : index
    %c0_3 = arith.constant 0 : index
    %2 = vector.load %arg2[%c0_2, %c0_3] : memref<32x288xf32, #tpu.memory_space<vmem>>, vector<32x288xf32>
    %cst = arith.constant dense<0.000000e+00> : vector<17x288xf32>
    %3 = tpu.matmul %1, %2, %cst {dimension_numbers = #tpu.dot_dimension_numbers<[1], [0], [0], [1], [0, 0, 1, 1], [], []>} : vector<17x32xf32>, vector<32x288xf32>, vector<17x288xf32> -> vector<17x288xf32>
    %c0_4 = arith.constant 0 : index
    %c0_5 = arith.constant 0 : index
    %4 = vector.load %arg3[%c0_4, %c0_5] : memref<1x288xf32, #tpu.memory_space<vmem>>, vector<1x288xf32>
    %5 = vector.broadcast %4 : vector<1x288xf32> to vector<17x288xf32>
    %6 = arith.addf %3, %5 : vector<17x288xf32>
    %cst_6 = arith.constant 0.000000e+00 : f32
    %7 = vector.broadcast %cst_6 : f32 to vector<17x288xf32>
    %8 = arith.maximumf %6, %7 : vector<17x288xf32>
    %9 = vector.extract_strided_slice %8 {offsets = [1, 0], sizes = [16, 288], strides = [1, 1]} : vector<17x288xf32> to vector<16x288xf32>
    %c0_7 = arith.constant 0 : index
    %c0_8 = arith.constant 0 : index
    %10 = vector.load %arg4[%c0_7, %c0_8] : memref<288x160xf32, #tpu.memory_space<vmem>>, vector<288x160xf32>
    %cst_9 = arith.constant dense<0.000000e+00> : vector<16x160xf32>
    %11 = tpu.matmul %9, %10, %cst_9 {dimension_numbers = #tpu.dot_dimension_numbers<[1], [0], [0], [1], [0, 0, 1, 1], [], []>} : vector<16x288xf32>, vector<288x160xf32>, vector<16x160xf32> -> vector<16x160xf32>
    %c0_10 = arith.constant 0 : index
    %c0_11 = arith.constant 0 : index
    %12 = vector.load %arg5[%c0_10, %c0_11] : memref<1x160xf32, #tpu.memory_space<vmem>>, vector<1x160xf32>
    %13 = vector.broadcast %12 : vector<1x160xf32> to vector<16x160xf32>
    %14 = arith.addf %11, %13 : vector<16x160xf32>
    %cst_12 = arith.constant 0.000000e+00 : f32
    %15 = vector.broadcast %cst_12 : f32 to vector<16x160xf32>
    %16 = arith.maximumf %14, %15 : vector<16x160xf32>
    %c0_13 = arith.constant 0 : index
    %c0_14 = arith.constant 0 : index
    %17 = vector.load %arg6[%c0_13, %c0_14] : memref<288x32xf32, #tpu.memory_space<vmem>>, vector<288x32xf32>
    %cst_15 = arith.constant dense<0.000000e+00> : vector<16x32xf32>
    %18 = tpu.matmul %9, %17, %cst_15 {dimension_numbers = #tpu.dot_dimension_numbers<[1], [0], [0], [1], [0, 0, 1, 1], [], []>} : vector<16x288xf32>, vector<288x32xf32>, vector<16x32xf32> -> vector<16x32xf32>
    %c0_16 = arith.constant 0 : index
    %c0_17 = arith.constant 0 : index
    %19 = vector.load %arg7[%c0_16, %c0_17] : memref<1x32xf32, #tpu.memory_space<vmem>>, vector<1x32xf32>
    %20 = vector.broadcast %19 : vector<1x32xf32> to vector<16x32xf32>
    %21 = arith.addf %18, %20 : vector<16x32xf32>
    %cst_18 = arith.constant 0.000000e+00 : f32
    %22 = vector.broadcast %cst_18 : f32 to vector<16x32xf32>
    %23 = arith.maximumf %21, %22 : vector<16x32xf32>
    %cst_19 = arith.constant 0.000000e+00 : f32
    %24 = vector.broadcast %cst_19 : f32 to vector<6x6x32xf32>
    %c0_20 = arith.constant 0 : index
    %c0_21 = arith.constant 0 : index
    %c0_22 = arith.constant 0 : index
    %25 = vector.load %arg15[%c0_20, %c0_21, %c0_22] : memref<6x6x32xf32, #tpu.memory_space<vmem>>, vector<6x6x32xf32>
    tpu.vector_store %arg15[%c0_20, %c0_21, %c0_22], %24 {strides = array<i32>} : memref<6x6x32xf32, #tpu.memory_space<vmem>>, vector<6x6x32xf32>,
    %26 = vector.shape_cast %23 : vector<16x32xf32> to vector<4x4x32xf32>
    %c1 = arith.constant 1 : index
    %c1_23 = arith.constant 1 : index
    %c0_24 = arith.constant 0 : index
    %27 = vector.load %arg15[%c1, %c1_23, %c0_24] : memref<6x6x32xf32, #tpu.memory_space<vmem>>, vector<4x4x32xf32>
    tpu.vector_store %arg15[%c1, %c1_23, %c0_24], %26 {strides = array<i32>} : memref<6x6x32xf32, #tpu.memory_space<vmem>>, vector<4x4x32xf32>,
    %c0_25 = arith.constant 0 : index
    %c0_26 = arith.constant 0 : index
    %c0_27 = arith.constant 0 : index
    %28 = vector.load %arg15[%c0_25, %c0_26, %c0_27] : memref<6x6x32xf32, #tpu.memory_space<vmem>>, vector<4x4x32xf32>
    %29 = vector.shape_cast %28 : vector<4x4x32xf32> to vector<16x32xf32>
    %c0_28 = arith.constant 0 : index
    %c1_29 = arith.constant 1 : index
    %c0_30 = arith.constant 0 : index
    %30 = vector.load %arg15[%c0_28, %c1_29, %c0_30] : memref<6x6x32xf32, #tpu.memory_space<vmem>>, vector<4x4x32xf32>
    %31 = vector.shape_cast %30 : vector<4x4x32xf32> to vector<16x32xf32>
    %c0_31 = arith.constant 0 : index
    %c2 = arith.constant 2 : index
    %c0_32 = arith.constant 0 : index
    %32 = vector.load %arg15[%c0_31, %c2, %c0_32] : memref<6x6x32xf32, #tpu.memory_space<vmem>>, vector<4x4x32xf32>
    %33 = vector.shape_cast %32 : vector<4x4x32xf32> to vector<16x32xf32>
    %c1_33 = arith.constant 1 : index
    %c0_34 = arith.constant 0 : index
    %c0_35 = arith.constant 0 : index
    %34 = vector.load %arg15[%c1_33, %c0_34, %c0_35] : memref<6x6x32xf32, #tpu.memory_space<vmem>>, vector<4x4x32xf32>
    %35 = vector.shape_cast %34 : vector<4x4x32xf32> to vector<16x32xf32>
    %c1_36 = arith.constant 1 : index
    %c1_37 = arith.constant 1 : index
    %c0_38 = arith.constant 0 : index
    %36 = vector.load %arg15[%c1_36, %c1_37, %c0_38] : memref<6x6x32xf32, #tpu.memory_space<vmem>>, vector<4x4x32xf32>
    %37 = vector.shape_cast %36 : vector<4x4x32xf32> to vector<16x32xf32>
    %c1_39 = arith.constant 1 : index
    %c2_40 = arith.constant 2 : index
    %c0_41 = arith.constant 0 : index
    %38 = vector.load %arg15[%c1_39, %c2_40, %c0_41] : memref<6x6x32xf32, #tpu.memory_space<vmem>>, vector<4x4x32xf32>
    %39 = vector.shape_cast %38 : vector<4x4x32xf32> to vector<16x32xf32>
    %c2_42 = arith.constant 2 : index
    %c0_43 = arith.constant 0 : index
    %c0_44 = arith.constant 0 : index
    %40 = vector.load %arg15[%c2_42, %c0_43, %c0_44] : memref<6x6x32xf32, #tpu.memory_space<vmem>>, vector<4x4x32xf32>
    %41 = vector.shape_cast %40 : vector<4x4x32xf32> to vector<16x32xf32>
    %c2_45 = arith.constant 2 : index
    %c1_46 = arith.constant 1 : index
    %c0_47 = arith.constant 0 : index
    %42 = vector.load %arg15[%c2_45, %c1_46, %c0_47] : memref<6x6x32xf32, #tpu.memory_space<vmem>>, vector<4x4x32xf32>
    %43 = vector.shape_cast %42 : vector<4x4x32xf32> to vector<16x32xf32>
    %c2_48 = arith.constant 2 : index
    %c2_49 = arith.constant 2 : index
    %c0_50 = arith.constant 0 : index
    %44 = vector.load %arg15[%c2_48, %c2_49, %c0_50] : memref<6x6x32xf32, #tpu.memory_space<vmem>>, vector<4x4x32xf32>
    %45 = vector.shape_cast %44 : vector<4x4x32xf32> to vector<16x32xf32>
    %46 = tpu.concatenate %29, %31, %33, %35, %37, %39, %41, %43, %45 in 1 : vector<16x32xf32>, vector<16x32xf32>, vector<16x32xf32>, vector<16x32xf32>, vector<16x32xf32>, vector<16x32xf32>, vector<16x32xf32>, vector<16x32xf32>, vector<16x32xf32> -> vector<16x288xf32>
    %c0_51 = arith.constant 0 : index
    %c0_52 = arith.constant 0 : index
    %47 = vector.load %arg8[%c0_51, %c0_52] : memref<288x128xf32, #tpu.memory_space<vmem>>, vector<288x128xf32>
    %cst_53 = arith.constant dense<0.000000e+00> : vector<16x128xf32>
    %48 = tpu.matmul %46, %47, %cst_53 {dimension_numbers = #tpu.dot_dimension_numbers<[1], [0], [0], [1], [0, 0, 1, 1], [], []>} : vector<16x288xf32>, vector<288x128xf32>, vector<16x128xf32> -> vector<16x128xf32>
    %c0_54 = arith.constant 0 : index
    %c0_55 = arith.constant 0 : index
    %49 = vector.load %arg9[%c0_54, %c0_55] : memref<1x128xf32, #tpu.memory_space<vmem>>, vector<1x128xf32>
    %50 = vector.broadcast %49 : vector<1x128xf32> to vector<16x128xf32>
    %51 = arith.addf %48, %50 : vector<16x128xf32>
    %cst_56 = arith.constant 0.000000e+00 : f32
    %52 = vector.broadcast %cst_56 : f32 to vector<16x128xf32>
    %53 = arith.maximumf %51, %52 : vector<16x128xf32>
    %c0_57 = arith.constant 0 : index
    %c0_58 = arith.constant 0 : index
    %54 = vector.load %arg10[%c0_57, %c0_58] : memref<288x32xf32, #tpu.memory_space<vmem>>, vector<288x32xf32>
    %cst_59 = arith.constant dense<0.000000e+00> : vector<17x32xf32>
    %55 = tpu.matmul %8, %54, %cst_59 {dimension_numbers = #tpu.dot_dimension_numbers<[1], [0], [0], [1], [0, 0, 1, 1], [], []>} : vector<17x288xf32>, vector<288x32xf32>, vector<17x32xf32> -> vector<17x32xf32>
    %c0_60 = arith.constant 0 : index
    %c0_61 = arith.constant 0 : index
    %56 = vector.load %arg11[%c0_60, %c0_61] : memref<160x32xf32, #tpu.memory_space<vmem>>, vector<160x32xf32>
    %cst_62 = arith.constant dense<0.000000e+00> : vector<16x32xf32>
    %57 = tpu.matmul %16, %56, %cst_62 {dimension_numbers = #tpu.dot_dimension_numbers<[1], [0], [0], [1], [0, 0, 1, 1], [], []>} : vector<16x160xf32>, vector<160x32xf32>, vector<16x32xf32> -> vector<16x32xf32>
    %c0_63 = arith.constant 0 : index
    %c0_64 = arith.constant 0 : index
    %58 = vector.load %arg12[%c0_63, %c0_64] : memref<128x32xf32, #tpu.memory_space<vmem>>, vector<128x32xf32>
    %cst_65 = arith.constant dense<0.000000e+00> : vector<16x32xf32>
    %59 = tpu.matmul %53, %58, %cst_65 {dimension_numbers = #tpu.dot_dimension_numbers<[1], [0], [0], [1], [0, 0, 1, 1], [], []>} : vector<16x128xf32>, vector<128x32xf32>, vector<16x32xf32> -> vector<16x32xf32>
    %60 = arith.addf %57, %59 : vector<16x32xf32>
    %61 = vector.extract_strided_slice %55 {offsets = [0, 0], sizes = [1, 32], strides = [1, 1]} : vector<17x32xf32> to vector<1x32xf32>
    %cst_66 = arith.constant 2.000000e+00 : f32
    %62 = vector.broadcast %cst_66 : f32 to vector<1x32xf32>
    %63 = arith.mulf %62, %61 : vector<1x32xf32>
    %c0_67 = arith.constant 0 : index
    %c0_68 = arith.constant 0 : index
    %64 = vector.load %arg13[%c0_67, %c0_68] : memref<1x32xf32, #tpu.memory_space<vmem>>, vector<1x32xf32>
    %65 = arith.addf %63, %64 : vector<1x32xf32>
    %66 = vector.extract_strided_slice %55 {offsets = [1, 0], sizes = [16, 32], strides = [1, 1]} : vector<17x32xf32> to vector<16x32xf32>
    %67 = arith.addf %66, %60 : vector<16x32xf32>
    %c0_69 = arith.constant 0 : index
    %c0_70 = arith.constant 0 : index
    %68 = vector.load %arg13[%c0_69, %c0_70] : memref<1x32xf32, #tpu.memory_space<vmem>>, vector<1x32xf32>
    %69 = vector.broadcast %68 : vector<1x32xf32> to vector<16x32xf32>
    %70 = arith.addf %67, %69 : vector<16x32xf32>
    %71 = tpu.concatenate %65, %70 in 0 : vector<1x32xf32>, vector<16x32xf32> -> vector<17x32xf32>
    %c0_71 = arith.constant 0 : index
    %c0_72 = arith.constant 0 : index
    %c0_73 = arith.constant 0 : index
    %72 = vector.load %arg14[%c0_71, %c0_72, %c0_73] : memref<1x17x32xf32, #tpu.memory_space<vmem>>, vector<1x17x32xf32>
    %73 = vector.shape_cast %72 : vector<1x17x32xf32> to vector<17x32xf32>
    %74 = vector.shape_cast %71 : vector<17x32xf32> to vector<1x17x32xf32>
    tpu.vector_store %arg14[%c0_71, %c0_72, %c0_73], %74 {strides = array<i32>} : memref<1x17x32xf32, #tpu.memory_space<vmem>>, vector<1x17x32xf32>,
    return
  }
  func.func @transform_0(%arg0: i32) -> (i32, i32, i32) {
    %c0_i32 = arith.constant 0 : i32
    %c0_i32_0 = arith.constant 0 : i32
    %c0_i32_1 = arith.constant 0 : i32
    return %arg0, %c0_i32, %c0_i32_0 : i32, i32, i32
  }
  func.func @transform_1(%arg0: i32) -> (i32, i32) {
    %c0_i32 = arith.constant 0 : i32
    %c0_i32_0 = arith.constant 0 : i32
    %c0_i32_1 = arith.constant 0 : i32
    return %c0_i32, %c0_i32_0 : i32, i32
  }
  func.func @transform_2(%arg0: i32) -> (i32, i32) {
    %c0_i32 = arith.constant 0 : i32
    %c0_i32_0 = arith.constant 0 : i32
    %c0_i32_1 = arith.constant 0 : i32
    return %c0_i32, %c0_i32_0 : i32, i32
  }
  func.func @transform_3(%arg0: i32) -> (i32, i32) {
    %c0_i32 = arith.constant 0 : i32
    %c0_i32_0 = arith.constant 0 : i32
    %c0_i32_1 = arith.constant 0 : i32
    return %c0_i32, %c0_i32_0 : i32, i32
  }
  func.func @transform_4(%arg0: i32) -> (i32, i32) {
    %c0_i32 = arith.constant 0 : i32
    %c0_i32_0 = arith.constant 0 : i32
    %c0_i32_1 = arith.constant 0 : i32
    return %c0_i32, %c0_i32_0 : i32, i32
  }
  func.func @transform_5(%arg0: i32) -> (i32, i32) {
    %c0_i32 = arith.constant 0 : i32
    %c0_i32_0 = arith.constant 0 : i32
    %c0_i32_1 = arith.constant 0 : i32
    return %c0_i32, %c0_i32_0 : i32, i32
  }
  func.func @transform_6(%arg0: i32) -> (i32, i32) {
    %c0_i32 = arith.constant 0 : i32
    %c0_i32_0 = arith.constant 0 : i32
    %c0_i32_1 = arith.constant 0 : i32
    return %c0_i32, %c0_i32_0 : i32, i32
  }
  func.func @transform_7(%arg0: i32) -> (i32, i32) {
    %c0_i32 = arith.constant 0 : i32
    %c0_i32_0 = arith.constant 0 : i32
    %c0_i32_1 = arith.constant 0 : i32
    return %c0_i32, %c0_i32_0 : i32, i32
  }
  func.func @transform_8(%arg0: i32) -> (i32, i32) {
    %c0_i32 = arith.constant 0 : i32
    %c0_i32_0 = arith.constant 0 : i32
    %c0_i32_1 = arith.constant 0 : i32
    return %c0_i32, %c0_i32_0 : i32, i32
  }
  func.func @transform_9(%arg0: i32) -> (i32, i32) {
    %c0_i32 = arith.constant 0 : i32
    %c0_i32_0 = arith.constant 0 : i32
    %c0_i32_1 = arith.constant 0 : i32
    return %c0_i32, %c0_i32_0 : i32, i32
  }
  func.func @transform_10(%arg0: i32) -> (i32, i32) {
    %c0_i32 = arith.constant 0 : i32
    %c0_i32_0 = arith.constant 0 : i32
    %c0_i32_1 = arith.constant 0 : i32
    return %c0_i32, %c0_i32_0 : i32, i32
  }
  func.func @transform_11(%arg0: i32) -> (i32, i32) {
    %c0_i32 = arith.constant 0 : i32
    %c0_i32_0 = arith.constant 0 : i32
    %c0_i32_1 = arith.constant 0 : i32
    return %c0_i32, %c0_i32_0 : i32, i32
  }
  func.func @transform_12(%arg0: i32) -> (i32, i32) {
    %c0_i32 = arith.constant 0 : i32
    %c0_i32_0 = arith.constant 0 : i32
    %c0_i32_1 = arith.constant 0 : i32
    return %c0_i32, %c0_i32_0 : i32, i32
  }
  func.func @transform_13(%arg0: i32) -> (i32, i32, i32) {
    %c0_i32 = arith.constant 0 : i32
    %c0_i32_0 = arith.constant 0 : i32
    %c0_i32_1 = arith.constant 0 : i32
    return %arg0, %c0_i32, %c0_i32_0 : i32, i32, i32
  }
}

</mosaic_0001>

<bundles_post_ra>
// kernel: tpu_custom_call.1
= control target key start
LH: loop header
LB: loop body
LE: loop exit
PB: predicated region body
PF: predicated region fallthrough
CT: control target
= control target key end

     0   :  { %s2667_s25 = smov 0   ;;  %s3557_s0 = inlined_call_operand.vmem [shape: f32[2,17,32], index: 0, kind: input, shape index: {}]   ;;  %s3558_s1 = inlined_call_operand.vmem [shape: f32[32,288], index: 1, kind: input, shape index: {}]   ;;  %s3559_s2 = inlined_call_operand.vmem [shape: f32[1,288], index: 2, kind: input, shape index: {}]   ;;  %s3560_s3 = inlined_call_operand.vmem [shape: f32[288,160], index: 3, kind: input, shape index: {}]   ;;  %s3561_s4 = inlined_call_operand.vmem [shape: f32[1,160], index: 4, kind: input, shape index: {}]   ;;  %s3562_s5 = inlined_call_operand.vmem [shape: f32[288,32], index: 5, kind: input, shape index: {}]   ;;  %s3563_s6 = inlined_call_operand.vmem [shape: f32[1,32], index: 6, kind: input, shape index: {}]   ;;  %s3564_s7 = inlined_call_operand.vmem [shape: f32[288,128], index: 7, kind: input, shape index: {}]   ;;  %s3565_s8 = inlined_call_operand.vmem [shape: f32[1,128], index: 8, kind: input, shape index: {}]   ;;  %s3566_s9 = inlined_call_operand.vmem [shape: f32[288,32], index: 9, kind: input, shape index: {}]   ;;  %s3567_s10 = inlined_call_operand.vmem [shape: f32[160,32], index: 10, kind: input, shape index: {}]   ;;  %s3568_s11 = inlined_call_operand.vmem [shape: f32[128,32], index: 11, kind: input, shape index: {}]   ;;  %s3569_s12 = inlined_call_operand.vmem [shape: f32[1,32], index: 12, kind: input, shape index: {}]   ;;  %s3570_s13 = inlined_call_operand.vmem [shape: f32[2,17,32], index: 13, kind: output, shape index: {}]  }
   0x1 LB: > { %s1966_s26 = sadd.s32 4294967295, %s2589_s25   ;;  %p1970_p0 = scmp.ge.s32.totalorder %s2589_s25, 1  ;;  %s2589_s25 = sphi %s2667_s25, %s23_s25  }
   0x2   : > { %p387_p1 = scmp.lt.s32.totalorder %s2589_s25, 3 }
   0x4   : > { %p388_p2 = pnand %p1970_p0, %p387_p1 }
   0x5   : > { %v445_v0 = vld [vmem:[%s3558_s1 + $0x8] sm:$0xff] (!%p388_p2)  ;;  %v448_v1 = vld [vmem:[%s3558_s1 + $0x20] sm:$0xff] (!%p388_p2)  ;;  %p431_p3 = scmp.lt.s32.totalorder (!%p388_p2), %s1966_s26, 1  ;;  %v447_v4 = vld [vmem:[%s3558_s1 + $0x18] sm:$0xff] (!%p388_p2)  ;;  %v2591_v7 = vmov (!%p388_p2), 0.0   ;;  %vm473_vm0 = vcmask (!%p388_p2), 261120  }
   0x6   : > { %391 = sbr.rel (%p388_p2) target bundleno = 1060 (0x424), region = 72  ;;  %v444_v2 = vld [vmem:[%s3558_s1] sm:$0xff] (!%p388_p2)  ;;  %v2246_v3 = vpack.c.bf16 (!%p388_p2), %v448_v1, %v445_v0  ;;  %v451_v5 = vld [vmem:[%s3558_s1 + $0x38] sm:$0xff] (!%p388_p2)  ;;  %v454_v6 = vld [vmem:[%s3558_s1 + $0x50] sm:$0xff] (!%p388_p2)  ;;  %547 = vmatprep.mubr.f32.mxu0 (!%p388_p2), %v2591_v7  ;;  %v2592_v17 = vmov (!%p388_p2), 0.0|0.0   ;;  %vm2593_vm1 = vmmov (!%p388_p2), 0  }
   0x7   : > { %v2248_v8 = vpack.c.bf16 (!%p388_p2), %v447_v4, %v444_v2  ;;  %v2250_v9 = vpack.c.bf16 (!%p388_p2), %v454_v6, %v451_v5  ;;  %v450_v10 = vld [vmem:[%s3558_s1 + $0x30] sm:$0xff] (!%p388_p2)  ;;  %v453_v11 = vld [vmem:[%s3558_s1 + $0x48] sm:$0xff] (!%p388_p2)  ;;  %v452_v18 = vld [vmem:[%s3558_s1 + $0x40] sm:$0xff] (!%p388_p2)  ;;  %vm748_vm2 = vcmask (!%p388_p2), 1046528   ;;  %vm1125_vm3 = vcmask (!%p388_p2), 259072   ;;  %s2595_s22 = smov (!%p388_p2), 96  }
   0x8   : > { %2247 = vmatprep.subr.bf16.mxu0 (!%p388_p2), %v2246_v3  ;;  %v2252_v12 = vpack.c.bf16 (!%p388_p2), %v453_v11, %v450_v10  ;;  %v446_v13 = vld [vmem:[%s3558_s1 + $0x10] sm:$0xff] (!%p388_p2)  ;;  %v449_v14 = vld [vmem:[%s3558_s1 + $0x28] sm:$0xff] (!%p388_p2)  ;;  %v455_v19 = vld [vmem:[%s3558_s1 + $0x58] sm:$0xff] (!%p388_p2)  ;;  %1126 = vst.msk [vmem:[#allocation2] sm:$0x3f] (!%p388_p2), %vm1125_vm3, %v2591_v7  ;;  %vm1139_vm4 = vcmask (!%p388_p2), 257024  }
   0x9   : > { %2249 = vmatpush1.bf16.msra.mxu0 (!%p388_p2), %v2248_v8  ;;  %v2255_v16 = vpack.c.bf16 (!%p388_p2), %v449_v14, %v446_v13  ;;  %v656_v20 = vld [vmem:[%s3560_s3 + $0x8] sm:$0xff] (!%p388_p2)  ;;  %v658_v21 = vld [vmem:[%s3560_s3 + $0x18] sm:$0xff] (!%p388_p2)  ;;  %v2258_v23 = vpack.c.bf16 (!%p388_p2), %v455_v19, %v452_v18  ;;  %v946_v26 = vld [vmem:[%s3562_s5 + $0x80] sm:$0xff] (!%p388_p2)  ;;  %1129 = vst.msk [vmem:[#allocation2 + $0x18] sm:$0x3f] (!%p388_p2), %vm1125_vm3, %v2591_v7  ;;  %s2596_s23 = smov (!%p388_p2), 64  }
   0xa   : > { %2251 = vmatprep.subr.bf16.mxu0 (!%p388_p2), %v2250_v9  ;;  %v2260_v24 = vpack.c.bf16 (!%p388_p2), %v658_v21, %v656_v20  ;;  %v947_v27 = vld [vmem:[%s3562_s5 + $0x88] sm:$0xff] (!%p388_p2)  ;;  %v655_v28 = vld [vmem:[%s3560_s3] sm:$0xff] (!%p388_p2)  ;;  %v657_v29 = vld [vmem:[%s3560_s3 + $0x10] sm:$0xff] (!%p388_p2)  ;;  %1130 = vst.msk [vmem:[#allocation2 + $0x20] sm:$0x3f] (!%p388_p2), %vm1125_vm3, %v2591_v7  ;;  %vm1277_vm5 = vcmask (!%p388_p2), 523264  }
   0xb   : > { %v2332_v30 = vpack.c.bf16 (!%p388_p2), %v947_v27, %v946_v26  ;;  %v930_v31 = vld [vmem:[%s3562_s5] sm:$0xff] (!%p388_p2)  ;;  %v660_v32 = vld [vmem:[%s3560_s3 + $0x28] sm:$0xff] (!%p388_p2)  ;;  %v662_v33 = vld [vmem:[%s3560_s3 + $0x38] sm:$0xff] (!%p388_p2)  ;;  %v2262_v38 = vpack.c.bf16 (!%p388_p2), %v657_v29, %v655_v28  ;;  %1131 = vst.msk [vmem:[#allocation2 + $0x28] sm:$0x3f] (!%p388_p2), %vm1125_vm3, %v2591_v7  ;;  %vm1280_vm6 = vcmask (!%p388_p2), 785408  }
   0xc   : > { %v931_v34 = vld [vmem:[%s3562_s5 + $0x8] sm:$0xff] (!%p388_p2)  ;;  %v948_v36 = vld [vmem:[%s3562_s5 + $0x90] sm:$0xff] (!%p388_p2)  ;;  %v949_v37 = vld [vmem:[%s3562_s5 + $0x98] sm:$0xff] (!%p388_p2)  ;;  %v2264_v42 = vpack.c.bf16 (!%p388_p2), %v662_v33, %v660_v32  ;;  %1127 = vst.msk [vmem:[#allocation2 + $0x8] sm:$0x3f] (!%p388_p2), %vm1125_vm3, %v2591_v7  ;;  %vm1887_vm7 = vcmask (!%p388_p2), 1040384  }
   0xd   : > { %s3572_s26 = smov (!%p431_p3, %s1966_s26), 1  ;;  %2253 = vmatpush1.bf16.msra.mxu0 %v2252_v12  ;;  %2333 = vmatprep.subr.bf16.mxu1 %v2332_v30  ;;  %v2334_v35 = vpack.c.bf16 %v931_v34, %v930_v31  ;;  %v2336_v39 = vpack.c.bf16 %v949_v37, %v948_v36  ;;  %v932_v40 = vld [vmem:[%s3562_s5 + $0x10] sm:$0xff]  ;;  %v933_v41 = vld [vmem:[%s3562_s5 + $0x18] sm:$0xff]  ;;  %v659_v43 = vld [vmem:[%s3560_s3 + $0x20] sm:$0xff]  ;;  %1128 = vst.msk [vmem:[#allocation2 + $0x10] sm:$0x3f] %vm1125_vm3, %v2591_v7 }
   0xe   : > { %s2520_s28 = smul.u32 24, %s3572_s26  ;;  %2254 = vmatprep.subr.bf16.mxu0 %v2592_v17  ;;  %v661_v44 = vld [vmem:[%s3560_s3 + $0x30] sm:$0xff]  ;;  %v2338_v45 = vpack.c.bf16 %v933_v41, %v932_v40  ;;  %v950_v46 = vld [vmem:[%s3562_s5 + $0xa0] sm:$0xff]  ;;  %v664_v47 = vld [vmem:[%s3560_s3 + $0x48] sm:$0xff]  ;;  %vm1909_vm8 = vcmask 253952  }
   0xf   : > { %2335 = vmatpush3.bf16.msra.mxu1 %v2334_v35  ;;  %v666_v48 = vld [vmem:[%s3560_s3 + $0x58] sm:$0xff]  ;;  %v951_v49 = vld [vmem:[%s3562_s5 + $0xa8] sm:$0xff]  ;;  %v934_v51 = vld [vmem:[%s3562_s5 + $0x20] sm:$0xff]  ;;  %v2266_v53 = vpack.c.bf16 %v661_v44, %v659_v43 }
  0x10   : > { %s435_s18 = scalar_lea.vmem %s3557_s0, %s2520_s28  ;;  %2337 = vmatprep.subr.bf16.mxu1 %v2336_v39  ;;  %v2340_v50 = vpack.c.bf16 %v951_v49, %v950_v46  ;;  %v935_v52 = vld [vmem:[%s3562_s5 + $0x28] sm:$0xff]  ;;  %v952_v54 = vld [vmem:[%s3562_s5 + $0xb0] sm:$0xff]  ;;  %v953_v55 = vld [vmem:[%s3562_s5 + $0xb8] sm:$0xff]  ;;  %v2268_v56 = vpack.c.bf16 %v666_v48, %v664_v47  ;;  %s440_s24 = scalar_lea.vmem %s3570_s13, %s2520_s28 }
  0x11   : > { %v441_v15 = vld [vmem:[%s435_s18] sm:$0xff]  ;;  %v442_v22 = vld [vmem:[%s435_s18 + $0x8] sm:$0xff]  ;;  %v2732_v25 = vld [vmem:[%s435_s18 + $0x10] sm:$0x1]  ;;  %v2342_v60 = vpack.c.bf16 %v935_v52, %v934_v51  ;;  %v2344_v62 = vpack.c.bf16 %v953_v55, %v952_v54  ;;  %s2594_s18 = smov 32  }
  0x12   : > { %1973 = vmatmul.mubr.msk.f32.vlgmr.msra.gmra.mrb[0].mxu0 %vm473_vm0, %v441_v15  ;;  %v663_v57 = vld [vmem:[%s3560_s3 + $0x40] sm:$0xff]  ;;  %v665_v58 = vld [vmem:[%s3560_s3 + $0x50] sm:$0xff]  ;;  %v668_v59 = vld [vmem:[%s3560_s3 + $0x68] sm:$0xff] }
  0x13   : > { %2256 = vmatpush3.bf16.msra.mxu0 %v2255_v16  ;;  %553 = vmatprep.mubr.f32.mxu0 %v2591_v7  ;;  %v670_v61 = vld [vmem:[%s3560_s3 + $0x78] sm:$0xff]  ;;  %v936_v63 = vld [vmem:[%s3562_s5 + $0x30] sm:$0xff]  ;;  %v954_v1 = vld [vmem:[%s3562_s5 + $0xc0] sm:$0xff]  ;;  %v2270_v3 = vpack.c.bf16 %v665_v58, %v663_v57 }
  0x14   : > { %2257 = vmatprep.subr.bf16.mxu0 %v2592_v17  ;;  %2339 = vmatpush3.bf16.msra.mxu1 %v2338_v45  ;;  %v937_v0 = vld [vmem:[%s3562_s5 + $0x38] sm:$0xff]  ;;  %v955_v2 = vld [vmem:[%s3562_s5 + $0xc8] sm:$0xff]  ;;  %v2272_v4 = vpack.c.bf16 %v670_v61, %v668_v59  ;;  %v667_v5 = vld [vmem:[%s3560_s3 + $0x60] sm:$0xff] }
  0x15   : > { %2341 = vmatprep.subr.bf16.mxu1 %v2340_v50  ;;  %v669_v6 = vld [vmem:[%s3560_s3 + $0x70] sm:$0xff]  ;;  %v672_v8 = vld [vmem:[%s3560_s3 + $0x88] sm:$0xff]  ;;  %v2346_v9 = vpack.c.bf16 %v937_v0, %v936_v63  ;;  %v674_v10 = vld [vmem:[%s3560_s3 + $0x98] sm:$0xff]  ;;  %v2348_v11 = vpack.c.bf16 %v955_v2, %v954_v1 }
  0x16   : > { %1974 = vmatmul.mubr.msk.f32.gmra.mrb[2].mxu0 %vm473_vm0, %v442_v22  ;;  %v938_v12 = vld [vmem:[%s3562_s5 + $0x40] sm:$0xff]  ;;  %v939_v13 = vld [vmem:[%s3562_s5 + $0x48] sm:$0xff]  ;;  %v2274_v14 = vpack.c.bf16 %v669_v6, %v667_v5  ;;  %v673_v18 = vld [vmem:[%s3560_s3 + $0x90] sm:$0xff] }
  0x17   : > { %559 = vmatprep.mubr.f32.mxu0 %v2591_v7  ;;  %2259 = vmatpush3.bf16.msra.mxu0 %v2258_v23  ;;  %v671_v16 = vld [vmem:[%s3560_s3 + $0x80] sm:$0xff]  ;;  %v2350_v19 = vpack.c.bf16 %v939_v13, %v938_v12  ;;  %v676_v20 = vld [vmem:[%s3560_s3 + $0xa8] sm:$0xff]  ;;  %v678_v21 = vld [vmem:[%s3560_s3 + $0xb8] sm:$0xff] }
  0x18   : > { %2261 = vmatprep.subr.bf16.mxu0 %v2260_v24  ;;  %2343 = vmatpush3.bf16.msra.mxu1 %v2342_v60  ;;  %v2280_v23 = vpack.c.bf16 %v678_v21, %v676_v20  ;;  %v675_v24 = vld [vmem:[%s3560_s3 + $0xa0] sm:$0xff]  ;;  %v680_v26 = vld [vmem:[%s3560_s3 + $0xc8] sm:$0xff]  ;;  %v682_v27 = vld [vmem:[%s3560_s3 + $0xd8] sm:$0xff] }
  0x19   : > { %2345 = vmatprep.subr.bf16.mxu1 %v2344_v62  ;;  %v2284_v29 = vpack.c.bf16 %v682_v27, %v680_v26  ;;  %v679_v30 = vld [vmem:[%s3560_s3 + $0xc0] sm:$0xff]  ;;  %v681_v31 = vld [vmem:[%s3560_s3 + $0xd0] sm:$0xff]  ;;  %v684_v32 = vld [vmem:[%s3560_s3 + $0xe8] sm:$0xff] }
  0x1a   : > { %1975 = vmatmul.mubr.msk.f32.gmra.mrb[4].mxu0 %vm473_vm0, %v2732_v25  ;;  %v686_v33 = vld [vmem:[%s3560_s3 + $0xf8] sm:$0xff]  ;;  %v2286_v34 = vpack.c.bf16 %v681_v31, %v679_v30  ;;  %v683_v36 = vld [vmem:[%s3560_s3 + $0xe0] sm:$0xff]  ;;  %v685_v37 = vld [vmem:[%s3560_s3 + $0xf0] sm:$0xff] }
  0x1b   : > { %2163 = vmatprep.mubr.msk.f32.mxu0 %vm2593_vm1, %v2591_v7  ;;  %v2288_v35 = vpack.c.bf16 %v686_v33, %v684_v32  ;;  %v690_v39 = vld [vmem:[%s3560_s3 + $0x118] sm:$0xff]  ;;  %v2290_v40 = vpack.c.bf16 %v685_v37, %v683_v36  ;;  %v689_v43 = vld [vmem:[%s3560_s3 + $0x110] sm:$0xff]  ;;  %v692_v44 = vld [vmem:[%s3560_s3 + $0x128] sm:$0xff] }
  0x1c   : > { %2347 = vmatpush3.bf16.msra.mxu1 %v2346_v9  ;;  %v694_v45 = vld [vmem:[%s3560_s3 + $0x138] sm:$0xff]  ;;  %v691_v48 = vld [vmem:[%s3560_s3 + $0x120] sm:$0xff]  ;;  %v693_v49 = vld [vmem:[%s3560_s3 + $0x130] sm:$0xff] }
  0x1d   : > { %2349 = vmatprep.subr.bf16.mxu1 %v2348_v11  ;;  %v2296_v47 = vpack.c.bf16 %v694_v45, %v692_v44  ;;  %v696_v50 = vld [vmem:[%s3560_s3 + $0x148] sm:$0xff]  ;;  %v698_v51 = vld [vmem:[%s3560_s3 + $0x158] sm:$0xff]  ;;  %v2298_v52 = vpack.c.bf16 %v693_v49, %v691_v48  ;;  %v695_v54 = vld [vmem:[%s3560_s3 + $0x140] sm:$0xff]  ;;  %v458_v49 = vlaneseq }
  0x1e   : > { %2164 = vmatmul.mubr.msk.f32.vlgmr.msra.gmra.mrb[6].mxu0 %vm473_vm0, %v441_v15  ;;  %v2276_v15 = vpack.c.bf16 %v674_v10, %v672_v8  ;;  %v697_v55 = vld [vmem:[%s3560_s3 + $0x150] sm:$0xff]  ;;  %v702_v57 = vld [vmem:[%s3560_s3 + $0x178] sm:$0xff]  ;;  %v699_v60 = vld [vmem:[%s3560_s3 + $0x160] sm:$0xff] }
  0x1f   : > { %2166 = vmatprep.mubr.msk.f32.mxu0 %vm2593_vm1, %v2591_v7  ;;  %2263 = vmatpush1.bf16.msra.mxu0 %v2262_v38  ;;  %v688_v38 = vld [vmem:[%s3560_s3 + $0x108] sm:$0xff]  ;;  %v2302_v58 = vpack.c.bf16 %v697_v55, %v695_v54  ;;  %v701_v61 = vld [vmem:[%s3560_s3 + $0x170] sm:$0xff]  ;;  %v706_v63 = vld [vmem:[%s3560_s3 + $0x198] sm:$0xff] }
  0x20   : > { %2265 = vmatprep.subr.bf16.mxu0 %v2264_v42  ;;  %2351 = vmatpush3.bf16.msra.mxu1 %v2350_v19  ;;  %v2292_v41 = vpack.c.bf16 %v690_v39, %v688_v38  ;;  %v687_v42 = vld [vmem:[%s3560_s3 + $0x100] sm:$0xff]  ;;  %v704_v62 = vld [vmem:[%s3560_s3 + $0x188] sm:$0xff]  ;;  %v2306_v0 = vpack.c.bf16 %v701_v61, %v699_v60  ;;  %v710_v6 = vld [vmem:[%s3560_s3 + $0x1b8] sm:$0xff] }
  0x21   : > { %v2294_v46 = vpack.c.bf16 %v689_v43, %v687_v42  ;;  %v2308_v1 = vpack.c.bf16 %v706_v63, %v704_v62  ;;  %v703_v2 = vld [vmem:[%s3560_s3 + $0x180] sm:$0xff]  ;;  %v708_v5 = vld [vmem:[%s3560_s3 + $0x1a8] sm:$0xff]  ;;  %v956_v8 = vld [vmem:[%s3562_s5 + $0xd0] sm:$0xff] }
  0x22   : > { %2167 = vmatmul.mubr.msk.f32.gmra.mrb[8].mxu0 %vm473_vm0, %v442_v22  ;;  %v2278_v22 = vpack.c.bf16 %v673_v18, %v671_v16  ;;  %v2312_v9 = vpack.c.bf16 %v710_v6, %v708_v5  ;;  %v957_v10 = vld [vmem:[%s3562_s5 + $0xd8] sm:$0xff]  ;;  %v707_v11 = vld [vmem:[%s3560_s3 + $0x1a0] sm:$0xff]  ;;  %v709_v12 = vld [vmem:[%s3560_s3 + $0x1b0] sm:$0xff] }
  0x23   : > { %2169 = vmatprep.mubr.msk.f32.mxu0 %vm2593_vm1, %v2591_v7  ;;  %2267 = vmatpush1.bf16.msra.mxu0 %v2266_v53  ;;  %v2300_v53 = vpack.c.bf16 %v698_v51, %v696_v50  ;;  %v2352_v13 = vpack.c.bf16 %v957_v10, %v956_v8  ;;  %v941_v16 = vld [vmem:[%s3562_s5 + $0x58] sm:$0xff]  ;;  %v712_v19 = vld [vmem:[%s3560_s3 + $0x1c8] sm:$0xff]  ;;  %v958_v21 = vld [vmem:[%s3562_s5 + $0xe0] sm:$0xff]  ;;  %v3040_v50 = vshrl.u32 %v458_v49, 7 }
  0x24   : > { %2269 = vmatprep.subr.bf16.mxu0 %v2268_v56  ;;  %v700_v56 = vld [vmem:[%s3560_s3 + $0x168] sm:$0xff]  ;;  %v714_v20 = vld [vmem:[%s3560_s3 + $0x1d8] sm:$0xff]  ;;  %v960_v33 = vld [vmem:[%s3562_s5 + $0xf0] sm:$0xff] }
  0x25   : > { %v2304_v59 = vpack.c.bf16 %v702_v57, %v700_v56  ;;  %2353 = vmatprep.subr.bf16.mxu1 %v2352_v13  ;;  %v716_v31 = vld [vmem:[%s3560_s3 + $0x1e8] sm:$0xff]  ;;  %v718_v32 = vld [vmem:[%s3560_s3 + $0x1f8] sm:$0xff]  ;;  %v715_v36 = vld [vmem:[%s3560_s3 + $0x1e0] sm:$0xff]  ;;  %v464_v51 = vsub.s32 1, %v3040_v50  ;;  %v468_v63 = vsub.s32 2, %v3040_v50 }
  0x26   : > { %2170 = vmatmul.mubr.msk.f32.gmra.mrb[10].mxu0 %vm473_vm0, %v2732_v25  ;;  %v677_v25 = vld [vmem:[%s3560_s3 + $0xb0] sm:$0xff]  ;;  %v720_v43 = vld [vmem:[%s3560_s3 + $0x208] sm:$0xff]  ;;  %v722_v44 = vld [vmem:[%s3560_s3 + $0x218] sm:$0xff] }
  0x27   : > { %2271 = vmatpush1.bf16.msra.mxu0 %v2270_v3  ;;  %v2282_v28 = vpack.c.bf16 %v677_v25, %v675_v24  ;;  %v705_v3 = vld [vmem:[%s3560_s3 + $0x190] sm:$0xff]  ;;  %v711_v24 = vld [vmem:[%s3560_s3 + $0x1c0] sm:$0xff]  ;;  %v2324_v45 = vpack.c.bf16 %v722_v44, %v720_v43 }
  0x28   : > { %2273 = vmatprep.subr.bf16.mxu0 %v2272_v4  ;;  %v2310_v4 = vpack.c.bf16 %v705_v3, %v703_v2  ;;  %v713_v25 = vld [vmem:[%s3560_s3 + $0x1d0] sm:$0xff]  ;;  %v719_v6 = vld [vmem:[%s3560_s3 + $0x200] sm:$0xff] }
  0x29   : > { %v2318_v27 = vpack.c.bf16 %v713_v25, %v711_v24  ;;  %v717_v37 = vld [vmem:[%s3560_s3 + $0x1f0] sm:$0xff] }
  0x2a   : > { %v2322_v39 = vpack.c.bf16 %v717_v37, %v715_v36  ;;  %v721_v8 = vld [vmem:[%s3560_s3 + $0x210] sm:$0xff] }
  0x2b   : > { %2275 = vmatpush1.bf16.msra.mxu0 %v2274_v14  ;;  %v2314_v14 = vpack.c.bf16 %v709_v12, %v707_v11 }
  0x2c   : > { %2277 = vmatprep.subr.bf16.mxu0 %v2276_v15  ;;  %v940_v15 = vld [vmem:[%s3562_s5 + $0x50] sm:$0xff] }
  0x2d   : > { %v2354_v18 = vpack.c.bf16 %v941_v16, %v940_v15  ;;  %v964_v15 = vld [vmem:[%s3562_s5 + $0x110] sm:$0xff]  ;;  %v965_v16 = vld [vmem:[%s3562_s5 + $0x118] sm:$0xff] }
  0x2f   : > { %2279 = vmatpush1.bf16.msra.mxu0 %v2278_v22  ;;  %2355 = vmatpush3.bf16.msra.mxu1 %v2354_v18  ;;  %v2316_v22 = vpack.c.bf16 %v714_v20, %v712_v19 }
  0x30   : > { %2281 = vmatprep.subr.bf16.mxu0 %v2280_v23  ;;  %v959_v23 = vld [vmem:[%s3562_s5 + $0xe8] sm:$0xff] }
  0x31   : > { %v2356_v26 = vpack.c.bf16 %v959_v23, %v958_v21  ;;  %v2326_v23 = vpack.c.bf16 %v721_v8, %v719_v6  ;;  %v1305_v6 = vld [vmem:[%s3564_s7 + $0x80] sm:$0xff]  ;;  %v1306_v8 = vld [vmem:[%s3564_s7 + $0x88] sm:$0xff] }
  0x33   : > { %2283 = vmatpush1.bf16.msra.mxu0 %v2282_v28  ;;  %v942_v28 = vld [vmem:[%s3562_s5 + $0x60] sm:$0xff]  ;;  %2357 = vmatprep.subr.bf16.mxu1 %v2356_v26 }
  0x34   : > { %2285 = vmatprep.subr.bf16.mxu0 %v2284_v29  ;;  %v943_v29 = vld [vmem:[%s3562_s5 + $0x68] sm:$0xff] }
  0x35   : > { %v2358_v30 = vpack.c.bf16 %v943_v29, %v942_v28  ;;  %v723_v28 = vld [vmem:[%s3560_s3 + $0x220] sm:$0xff]  ;;  %v725_v29 = vld [vmem:[%s3560_s3 + $0x230] sm:$0xff] }
  0x36   : > { %v2330_v36 = vpack.c.bf16 %v725_v29, %v723_v28  ;;  %v1294_v28 = vld [vmem:[%s3564_s7 + $0x28] sm:$0xff]  ;;  %v1311_v29 = vld [vmem:[%s3564_s7 + $0xb0] sm:$0xff] }
  0x37   : > { %2287 = vmatpush1.bf16.msra.mxu0 %v2286_v34  ;;  %2359 = vmatpush3.bf16.msra.mxu1 %v2358_v30  ;;  %v2320_v34 = vpack.c.bf16 %v718_v32, %v716_v31  ;;  %v2368_v30 = vpack.c.bf16 %v965_v16, %v964_v15 }
  0x38   : > { %2289 = vmatprep.subr.bf16.mxu0 %v2288_v35  ;;  %v961_v35 = vld [vmem:[%s3562_s5 + $0xf8] sm:$0xff] }
  0x39   : > { %v2360_v38 = vpack.c.bf16 %v961_v35, %v960_v33 }
  0x3b   : > { %2291 = vmatpush1.bf16.msra.mxu0 %v2290_v40  ;;  %v944_v40 = vld [vmem:[%s3562_s5 + $0x70] sm:$0xff]  ;;  %2361 = vmatprep.subr.bf16.mxu1 %v2360_v38 }
  0x3c   : > { %2293 = vmatprep.subr.bf16.mxu0 %v2292_v41  ;;  %v945_v41 = vld [vmem:[%s3562_s5 + $0x78] sm:$0xff] }
  0x3d   : > { %v2362_v42 = vpack.c.bf16 %v945_v41, %v944_v40 }
  0x3f   : > { %2295 = vmatpush1.bf16.msra.mxu0 %v2294_v46  ;;  %2363 = vmatpush3.bf16.msra.mxu1 %v2362_v42  ;;  %v962_v46 = vld [vmem:[%s3562_s5 + $0x100] sm:$0xff] }
  0x40   : > { %2297 = vmatprep.subr.bf16.mxu0 %v2296_v47  ;;  %v963_v47 = vld [vmem:[%s3562_s5 + $0x108] sm:$0xff] }
  0x41   : > { %v2364_v48 = vpack.c.bf16 %v963_v47, %v962_v46 }
  0x43   : > { %2299 = vmatpush1.bf16.msra.mxu0 %v2298_v52  ;;  %2365 = vmatprep.subr.bf16.mxu1 %v2364_v48  ;;  %v456_v52 = vld [vmem:[%s3559_s2] sm:$0x7] }
  0x44   : > { %2301 = vmatprep.subr.bf16.mxu0 %v2300_v53  ;;  %v3047_v53 = vsub.s32 0, %v3040_v50  ;;  %v465_v54 = vrot.slane %v456_v52, %v464_v51  ;;  %v469_v13 = vrot.slane %v456_v52, %v468_v63  ;;  %v1324_v63 = vld [vmem:[%s3564_s7 + $0x118] sm:$0xff] }
  0x46   : > { %v461_v55 = vrot.slane %v456_v52, %v3047_v53 }
  0x47   : > { %2303 = vmatpush1.bf16.msra.mxu0 %v2302_v58 }
  0x48   : > { %2305 = vmatprep.subr.bf16.mxu0 %v2304_v59 }
  0x4b   : > { %2307 = vmatpush1.bf16.msra.mxu0 %v2306_v0 }
  0x4c   : > { %2309 = vmatprep.subr.bf16.mxu0 %v2308_v1 }
  0x4f   : > { %2311 = vmatpush1.bf16.msra.mxu0 %v2310_v4 }
  0x50   : > { %2313 = vmatprep.subr.bf16.mxu0 %v2312_v9  ;;  %v724_v9 = vld [vmem:[%s3560_s3 + $0x228] sm:$0xff] }
  0x53   : > { %2315 = vmatpush1.bf16.msra.mxu0 %v2314_v14  ;;  %v726_v14 = vld [vmem:[%s3560_s3 + $0x238] sm:$0xff] }
  0x54   : > { %2317 = vmatprep.subr.bf16.mxu0 %v2316_v22 }
  0x57   : > { %2319 = vmatpush1.bf16.msra.mxu0 %v2318_v27  ;;  %v2328_v27 = vpack.c.bf16 %v726_v14, %v724_v9  ;;  %v1289_v9 = vld [vmem:[%s3564_s7] sm:$0xff]  ;;  %v1308_v14 = vld [vmem:[%s3564_s7 + $0x98] sm:$0xff] }
  0x58   : > { %2321 = vmatprep.subr.bf16.mxu0 %v2320_v34 }
  0x5b   : > { %2323 = vmatpush1.bf16.msra.mxu0 %v2322_v39 }
  0x5c   : > { %2325 = vmatprep.subr.bf16.mxu0 %v2324_v45 }
  0xe5   : > { %v549_v56 = vpop.f32.mrb[0].mxu0 }
  0xe6   : > { %v551_v57 = vpop.f32.mrb[1].mxu0  ;;  %v3054_v59 = vadd.f32 %v549_v56, %v461_v55  ;;  %v1321_v56 = vld [vmem:[%s3564_s7 + $0x100] sm:$0xff] }
  0xe7   : > { %v3052_v58 = vadd.f32 %v551_v57, %v465_v54  ;;  %v1322_v57 = vld [vmem:[%s3564_s7 + $0x108] sm:$0xff] }
  0xe8   : > { %v646_v2 = vmax.f32 %v3054_v59, 0.0  ;;  %v1696_v59 = vld [vmem:[%s3567_s10 + $0x30] sm:$0xff] }
  0xe9   : > { %v555_v60 = vpop.f32.mrb[2].mxu0  ;;  %v647_v0 = vmax.f32 %v3052_v58, 0.0  ;;  %v1513_v58 = vld [vmem:[%s3566_s9 + $0xc8] sm:$0xff] }
  0xea   : > { %v3056_v61 = vadd.f32 %v555_v60, %v461_v55  ;;  %v557_v62 = vpop.f32.mrb[3].mxu0  ;;  %v749_v21 = vrot.slane %v646_v2, 1  ;;  %v2404_v60 = vpack.c.bf16 %v1322_v57, %v1321_v56 }
  0xeb   : > { %v3060_v1 = vadd.f32 %v557_v62, %v465_v54  ;;  %v752_v18 = vrot.slane %v647_v0, 1  ;;  %v1323_v62 = vld [vmem:[%s3564_s7 + $0x110] sm:$0xff] }
  0xec   : > { %v649_v3 = vmax.f32 %v3056_v61, 0.0 }
  0xed   : > { %v650_v4 = vmax.f32 %v3060_v1, 0.0  ;;  %v561_v5 = vpop.f32.mrb[4].mxu0  ;;  %v1697_v1 = vld [vmem:[%s3567_s10 + $0x38] sm:$0xff] }
  0xee   : > { %v750_v10 = vrot.slane %v649_v3, 1  ;;  %v3076_v11 = vadd.f32 %v561_v5, %v461_v55  ;;  %v563_v12 = vpop.f32.mrb[5].mxu0  ;;  %v2408_v5 = vpack.c.bf16 %v1324_v63, %v1323_v62  ;;  %v2492_v61 = vpack.c.bf16 %v1697_v1, %v1696_v59 }
  0xef   : > { %v753_v19 = vrot.slane %v650_v4, 1  ;;  %v3091_v20 = vadd.f32 %v563_v12, %v465_v54  ;;  %v1290_v12 = vld [vmem:[%s3564_s7 + $0x8] sm:$0xff] }
  0xf0   : > { %v652_v22 = vmax.f32 %v3076_v11, 0.0  ;;  %v751_v34 = vsel %vm748_vm2, %v749_v21, %v750_v10  ;;  %v2374_v15 = vpack.c.bf16 %v1290_v12, %v1289_v9  ;;  %v1309_v21 = vld [vmem:[%s3564_s7 + $0xa0] sm:$0xff]  ;;  %v1700_v11 = vld [vmem:[%s3567_s10 + $0x50] sm:$0xff] }
  0xf1   : > { %v653_v24 = vmax.f32 %v3091_v20, 0.0  ;;  %v632_v25 = vpop.f32.mrb[6].mxu0  ;;  %v754_v26 = vsel %vm748_vm2, %v752_v18, %v753_v19  ;;  %v1291_v18 = vld [vmem:[%s3564_s7 + $0x10] sm:$0xff] }
  0xf2   : > { %v758_v31 = vrot.slane %v652_v22, 1  ;;  %v3106_v32 = vadd.f32 %v632_v25, %v469_v13  ;;  %v2165_v33 = vpop.f32.mrb[7].mxu0  ;;  %836 = vmatprep.mubr.f32.mxu0 %v754_v26  ;;  %1037 = vmatprep.mubr.f32.mxu1 %v754_v26 }
  0xf3   : > { %v760_v35 = vrot.slane %v653_v24, 1  ;;  %837 = vmatmul.mubr.f32.vlgmr.msra.gmra.mrb[12].mxu0 %v751_v34  ;;  %1038 = vmatmul.mubr.f32.vlgmr.msra.gmra.mrb[0].mxu1 %v751_v34  ;;  %v1295_v34 = vld [vmem:[%s3564_s7 + $0x30] sm:$0xff] }
  0xf4   : > { %2327 = vmatpush1.bf16.msra.mxu0 %v2326_v23  ;;  %2367 = vmatpush3.bf16.msra.mxu1 %v2364_v48  ;;  %v648_v39 = vmax.f32 %v3106_v32, 0.0  ;;  %v759_v42 = vsel %vm748_vm2, %v750_v10, %v758_v31  ;;  %v2372_v10 = vpack.c.bf16 %v1306_v8, %v1305_v6  ;;  %v1310_v23 = vld [vmem:[%s3564_s7 + $0xa8] sm:$0xff] }
  0xf5   : > { %v637_v37 = vpop.f32.mrb[8].mxu0  ;;  %v761_v38 = vsel %vm748_vm2, %v753_v19, %v760_v35  ;;  %2329 = vmatprep.subr.bf16.mxu0 %v2328_v27  ;;  %2369 = vmatprep.subr.bf16.mxu1 %v2368_v30  ;;  %v1292_v19 = vld [vmem:[%s3564_s7 + $0x18] sm:$0xff]  ;;  %v2380_v26 = vpack.c.bf16 %v1310_v23, %v1309_v21  ;;  %v1293_v27 = vld [vmem:[%s3564_s7 + $0x20] sm:$0xff]  ;;  %v1505_v32 = vld [vmem:[%s3566_s9 + $0x88] sm:$0xff] }
  0xf6   : > { %v3113_v40 = vadd.f32 %v637_v37, %v469_v13  ;;  %v2168_v41 = vpop.f32.mrb[9].mxu0  ;;  %842 = vmatprep.mubr.f32.mxu0 %v761_v38  ;;  %1042 = vmatprep.mubr.f32.mxu1 %v761_v38  ;;  %v755_v45 = vrot.slane %v648_v39, 1  ;;  %v2378_v25 = vpack.c.bf16 %v1292_v19, %v1291_v18  ;;  %v2382_v31 = vpack.c.bf16 %v1294_v28, %v1293_v27  ;;  %v1296_v35 = vld [vmem:[%s3564_s7 + $0x38] sm:$0xff]  ;;  %v1314_v37 = vld [vmem:[%s3564_s7 + $0xc8] sm:$0xff]  ;;  %v1317_v28 = vld [vmem:[%s3564_s7 + $0xe0] sm:$0xff] }
  0xf7   : > { %843 = vmatmul.mubr.f32.gmra.mrb[14].mxu0 %v759_v42  ;;  %1043 = vmatmul.mubr.f32.gmra.mrb[2].mxu1 %v759_v42  ;;  %v2386_v38 = vpack.c.bf16 %v1296_v35, %v1295_v34  ;;  %v1297_v42 = vld [vmem:[%s3564_s7 + $0x40] sm:$0xff]  ;;  %v1521_v35 = vld [vmem:[%s3566_s9 + $0x108] sm:$0xff] }
  0xf8   : > { %v651_v43 = vmax.f32 %v3113_v40, 0.0  ;;  %2331 = vmatpush1.bf16.msra.mxu0 %v2330_v36  ;;  %913 = vmatprep.mubr.f32.mxu0 %v2591_v7  ;;  %v1313_v36 = vld [vmem:[%s3564_s7 + $0xc0] sm:$0xff]  ;;  %v1712_v40 = vld [vmem:[%s3568_s11 + $0x10] sm:$0xff] }
  0xf9   : > { %v642_v44 = vpop.f32.mrb[10].mxu0  ;;  %2371 = vmatpush3.bf16.msra.mxu1 %v2368_v30  ;;  %2405 = vmatprep.subr.bf16.mxu0 %v2404_v60  ;;  %v1312_v30 = vld [vmem:[%s3564_s7 + $0xb8] sm:$0xff]  ;;  %v2388_v41 = vpack.c.bf16 %v1314_v37, %v1313_v36  ;;  %v1520_v34 = vld [vmem:[%s3566_s9 + $0x100] sm:$0xff] }
  0xfa   : > { %v756_v46 = vrot.slane %v651_v43, 1  ;;  %v3122_v47 = vadd.f32 %v642_v44, %v469_v13  ;;  %v2171_v48 = vpop.f32.mrb[11].mxu0  ;;  %v1307_v13 = vld [vmem:[%s3564_s7 + $0x90] sm:$0xff]  ;;  %2373 = vmatprep.subr.bf16.mxu1 %v2372_v10  ;;  %v2384_v33 = vpack.c.bf16 %v1312_v30, %v1311_v29  ;;  %v1298_v44 = vld [vmem:[%s3564_s7 + $0x48] sm:$0xff]  ;;  %v1981_v10 = vld [vmem:[%s3563_s6] ss:$0 sm:$0xff] }
  0xfb   : > { %v2376_v16 = vpack.c.bf16 %v1308_v14, %v1307_v13  ;;  %v2390_v48 = vpack.c.bf16 %v1298_v44, %v1297_v42  ;;  %v1318_v29 = vld [vmem:[%s3564_s7 + $0xe8] sm:$0xff]  ;;  %v1301_v30 = vld [vmem:[%s3564_s7 + $0x60] sm:$0xff]  ;;  %v1523_v42 = vld [vmem:[%s3566_s9 + $0x118] sm:$0xff] }
  0xfc   : > { %v757_v49 = vsel %vm748_vm2, %v755_v45, %v756_v46  ;;  %v654_v52 = vmax.f32 %v3122_v47, 0.0  ;;  %v1315_v45 = vld [vmem:[%s3564_s7 + $0xd0] sm:$0xff] }
  0xfd   : > { %1979 = vmatmul.mubr.msk.f32.vlgmr.msra.gmra.mrb[12].mxu0 %vm473_vm0, %v757_v49  ;;  %2180 = vmatprep.mubr.msk.f32.mxu1 %vm473_vm0, %v757_v49 }
  0xfe   : > { %v762_v54 = vrot.slane %v654_v52, 1  ;;  %919 = vmatprep.mubr.f32.mxu0 %v2591_v7  ;;  %2407 = vmatpush3.bf16.msra.mxu0 %v2404_v60 }
  0xff   : > { %2409 = vmatprep.subr.bf16.mxu0 %v2408_v5 }
 0x100   : > { %v763_v55 = vsel %vm748_vm2, %v756_v46, %v762_v54  ;;  %v1316_v46 = vld [vmem:[%s3564_s7 + $0xd8] sm:$0xff]  ;;  %v1299_v54 = vld [vmem:[%s3564_s7 + $0x50] sm:$0xff] }
 0x101   : > { %1980 = vmatmul.mubr.msk.f32.gmra.mrb[14].mxu0 %vm473_vm0, %v763_v55  ;;  %2181 = vmatmul.mubr.msk.f32.vlgmr.msra.gmra.mrb[4].mxu1 %vm473_vm0, %v763_v55  ;;  %v2392_v49 = vpack.c.bf16 %v1316_v46, %v1315_v45  ;;  %v1300_v55 = vld [vmem:[%s3564_s7 + $0x58] sm:$0xff]  ;;  %v2445_v45 = vpack.c.bf16 %v1521_v35, %v1520_v34  ;;  %v1716_v35 = vld [vmem:[%s3568_s11 + $0x30] sm:$0xff] }
 0x102   : > { %2411 = vmatpush3.bf16.msra.mxu0 %v2408_v5  ;;  %2375 = vmatpush3.bf16.msra.mxu1 %v2374_v15  ;;  %v2394_v56 = vpack.c.bf16 %v1300_v55, %v1299_v54 }
 0x103   : > { %2444 = vmatprep.subr.bf16.mxu0 %v2592_v17  ;;  %2377 = vmatprep.subr.bf16.mxu1 %v2376_v16 }
 0x106   : > { %2379 = vmatpush3.bf16.msra.mxu1 %v2378_v25 }
 0x107   : > { %2381 = vmatprep.subr.bf16.mxu1 %v2380_v26 }
 0x10a   : > { %2383 = vmatpush3.bf16.msra.mxu1 %v2382_v31  ;;  %v2396_v31 = vpack.c.bf16 %v1318_v29, %v1317_v28  ;;  %v1504_v29 = vld [vmem:[%s3566_s9 + $0x80] sm:$0xff] }
 0x10b   : > { %2385 = vmatprep.subr.bf16.mxu1 %v2384_v33  ;;  %v1302_v33 = vld [vmem:[%s3564_s7 + $0x68] sm:$0xff] }
 0x10c   : > { %v2398_v36 = vpack.c.bf16 %v1302_v33, %v1301_v30  ;;  %v1710_v30 = vld [vmem:[%s3568_s11] sm:$0xff]  ;;  %v1715_v33 = vld [vmem:[%s3568_s11 + $0x28] sm:$0xff] }
 0x10e   : > { %2387 = vmatpush3.bf16.msra.mxu1 %v2386_v38 }
 0x10f   : > { %2389 = vmatprep.subr.bf16.mxu1 %v2388_v41  ;;  %v1522_v41 = vld [vmem:[%s3566_s9 + $0x110] sm:$0xff] }
 0x112   : > { %2391 = vmatpush3.bf16.msra.mxu1 %v2390_v48 }
 0x113   : > { %2393 = vmatprep.subr.bf16.mxu1 %v2392_v49 }
 0x116   : > { %2395 = vmatpush3.bf16.msra.mxu1 %v2394_v56 }
 0x117   : > { %2397 = vmatprep.subr.bf16.mxu1 %v2396_v31  ;;  %v1711_v31 = vld [vmem:[%s3568_s11 + $0x8] sm:$0xff] }
 0x11a   : > { %2399 = vmatpush3.bf16.msra.mxu1 %v2398_v36  ;;  %v1717_v36 = vld [vmem:[%s3568_s11 + $0x38] sm:$0xff] }
 0x1c6   : > { %v2033_v57 = vpop.f32.mrb[0].mxu1 }
 0x1c7   : > { %v2034_v60 = vpop.f32.mrb[1].mxu1 }
 0x1c8   : > { %v2035_v62 = vadd.f32 %v2034_v60, %v2033_v57  ;;  %v2448_v60 = vpack.c.bf16 %v1523_v42, %v1522_v41  ;;  %v1719_v41 = vld [vmem:[%s3568_s11 + $0x48] sm:$0xff] }
 0x1ca   : > { %v2036_v63 = vpop.f32.mrb[2].mxu1  ;;  %v1040_v15 = vadd.f32 %v2035_v62, %v1981_v10 }
 0x1cb   : > { %v2037_v5 = vpop.f32.mrb[3].mxu1 }
 0x1cc   : > { %v2038_v6 = vadd.f32 %v2037_v5, %v2036_v63 }
 0x1ce   : > { %v1045_v12 = vadd.f32 %v2038_v6, %v1981_v10 }
 0x1d0   : > { %v3225_v8 = vpop.f32.mrb[12].mxu0 }
 0x1d1   : > { %v3227_v9 = vpop.f32.mrb[13].mxu0 }
 0x1d4   : > { %v3232_v13 = vpop.f32.mrb[14].mxu0  ;;  %v2182_v14 = vpop.f32.mrb[4].mxu1 }
 0x1d5   : > { %v1120_v16 = vadd.f32 %v2182_v14, %v1045_v12  ;;  %v3234_v18 = vpop.f32.mrb[15].mxu0  ;;  %v1114_v19 = vpop.f32.mrb[5].mxu1 }
 0x1d6   : > { %v1115_v21 = vadd.f32 %v1114_v19, %v1040_v15  ;;  %v1320_v19 = vld [vmem:[%s3564_s7 + $0xf8] sm:$0xff] }
 0x1d7   : > { %v1124_v23 = vmax.f32 %v1120_v16, 0.0  ;;  %v1319_v16 = vld [vmem:[%s3564_s7 + $0xf0] sm:$0xff] }
 0x1d8   : > { %v1123_v25 = vmax.f32 %v1115_v21, 0.0  ;;  %v1303_v21 = vld [vmem:[%s3564_s7 + $0x70] sm:$0xff] }
 0x1d9   : > { %v1135_v26 = vcombine.high %v1124_v23, %v1124_v23  ;;  %1142 = vst.msk [vmem:[#allocation2 + $0x19] sm:$0xf] %vm1139_vm4, %v1124_v23 }
 0x1da   : > { %v1134_v27 = vcombine.high %v1123_v25, %v1123_v25  ;;  %1140 = vst.msk [vmem:[#allocation2 + $0x9] sm:$0xf] %vm1139_vm4, %v1123_v25  ;;  %v2400_v25 = vpack.c.bf16 %v1320_v19, %v1319_v16 }
 0x1db   : > { %1143 = vst.msk [vmem:[#allocation2 + $0x21] sm:$0xf] %vm1139_vm4, %v1135_v26  ;;  %v1304_v26 = vld [vmem:[%s3564_s7 + $0x78] sm:$0xff] }
 0x1dc   : > { %1141 = vst.msk [vmem:[#allocation2 + $0x11] sm:$0xf] %vm1139_vm4, %v1134_v27  ;;  %v2402_v28 = vpack.c.bf16 %v1304_v26, %v1303_v21  ;;  %2401 = vmatprep.subr.bf16.mxu1 %v2400_v25 }
 0x1de   : > { %2403 = vmatpush3.bf16.msra.mxu1 %v2402_v28 }
 0x1e1   : > { %v2567_v38 = vld [vmem:[#allocation2 + $0x1] ss:$8 sps:$4 sm:$0xff]  }
 0x1e2   : > { %v2566_v37 = vld [vmem:[#allocation2 + $0x22] ss:$8 sps:$4 sm:$0xff]  }
 0x1e3   : > { %v2565_v44 = vld [vmem:[#allocation2 + $0x12] ss:$8 sps:$4 sm:$0xff]   ;;  %v2571_v55 = vld [vmem:[#allocation2 + $0x2] ss:$8 sps:$4 sm:$0xff]  }
 0x1e4   : > { %v2568_v46 = vld [vmem:[#allocation2 + $0xa] ss:$8 sps:$4 sm:$0xff]   ;;  %2191 = vmatprep.mubr.msk.f32.mxu0 %vm473_vm0, %v2565_v44  ;;  %v2574_v63 = vld [vmem:[#allocation2 + $0x1a] ss:$8 sps:$4 sm:$0xff]  }
 0x1e5   : > { %v2569_v48 = vld [vmem:[#allocation2 + $0x8] ss:$8 sps:$4 sm:$0xff]   ;;  %2192 = vmatmul.mubr.msk.f32.vlgmr.msra.gmra.mrb[16].mxu0 %vm473_vm0, %v2566_v37  ;;  %v2535_v54 = vpack.i.bf16 %v2567_v38, %v2568_v46  ;;  %v2577_v14 = vld [vmem:[#allocation2 + $0x18] ss:$8 sps:$4 sm:$0xff]   ;;  %v2462_v37 = vpack.c.bf16 %v1717_v36, %v1716_v35 }
 0x1e6   : > { %v2570_v49 = vld [vmem:[#allocation2 + $0x11] ss:$8 sps:$4 sm:$0xff]   ;;  %2446 = vmatpush3.bf16.msra.mxu0 %v2445_v45  ;;  %2202 = vmatprep.mubr.msk.f32.mxu0 %vm2593_vm1, %v2591_v7  ;;  %v2576_v10 = vld [vmem:[#allocation2 + $0x20] ss:$8 sps:$4 sm:$0xff]  }
 0x1e7   : > { %v2572_v56 = vld [vmem:[#allocation2 + $0x10] ss:$8 sps:$4 sm:$0xff]   ;;  %v2545_v57 = vpack.i.bf16 %v2569_v48, %v2570_v49  ;;  %2536 = vrot.lane.b32.xlu0 %v2535_v54, %s2594_s18  ;;  %2447 = vmatprep.subr.bf16.mxu0 %v2592_v17  ;;  %v2578_v15 = vld [vmem:[#allocation2 + $0x21] ss:$8 sps:$4 sm:$0xff]  }
 0x1e8   : > { %v2573_v62 = vld [vmem:[#allocation2 + $0x11] ss:$8 sps:$4 sm:$0xff]   ;;  %v2540_v5 = vpack.i.bf16 %v2571_v55, %v2572_v56  ;;  %v2560_v27 = vpack.i.bf16 %v2577_v14, %v2578_v15  ;;  %v2579_v49 = vld [vmem:[#allocation2] ss:$8 sps:$4 sm:$0xff]  }
 0x1e9   : > { %2546 = vrot.lane.b32.xlu1 %v2545_v57, %s2595_s22  ;;  %v2575_v6 = vld [vmem:[#allocation2 + $0x12] ss:$8 sps:$4 sm:$0xff]   ;;  %v2550_v12 = vpack.i.bf16 %v2573_v62, %v2574_v63 }
 0x1ea   : > { %2449 = vmatpush3.bf16.msra.mxu0 %v2448_v60  ;;  %v2555_v23 = vpack.i.bf16 %v2575_v6, %v2576_v10  ;;  %v1718_v38 = vld [vmem:[%s3568_s11 + $0x40] sm:$0xff]  ;;  %v1489_v57 = vld [vmem:[%s3566_s9 + $0x8] sm:$0xff]  ;;  %v1506_v10 = vld [vmem:[%s3566_s9 + $0x90] sm:$0xff] }
 0x1eb   : > { %2541 = vrot.lane.b32.xlu0 %v2540_v5, %s2596_s23  ;;  %v2466_v42 = vpack.c.bf16 %v1719_v41, %v1718_v38  ;;  %v2580_v55 = vld [vmem:[#allocation2 + $0x9] ss:$8 sps:$4 sm:$0xff]   ;;  %v2581_v26 = vld [vmem:[#allocation2 + $0x19] ss:$8 sps:$4 sm:$0xff]  }
 0x1ec   : > { %v1488_v56 = vld [vmem:[%s3566_s9] sm:$0xff] }
 0x1ed   : > { %2551 = vrot.lane.b32.xlu1 %v2550_v12, %s2594_s18  ;;  %2203 = vmatmul.mubr.msk.f32.vlgmr.msra.gmra.mrb[18].mxu0 %vm473_vm0, %v648_v39  ;;  %v2412_v39 = vpack.c.bf16 %v1505_v32, %v1504_v29  ;;  %v1507_v12 = vld [vmem:[%s3566_s9 + $0x98] sm:$0xff]  ;;  %v2414_v25 = vpack.c.bf16 %v1489_v57, %v1488_v56  ;;  %v1494_v57 = vld [vmem:[%s3566_s9 + $0x30] sm:$0xff] }
 0x1ee   : > { %2205 = vmatprep.mubr.msk.f32.mxu0 %vm2593_vm1, %v2591_v7  ;;  %v2416_v32 = vpack.c.bf16 %v1507_v12, %v1506_v10  ;;  %v1514_v10 = vld [vmem:[%s3566_s9 + $0xd0] sm:$0xff]  ;;  %v1515_v12 = vld [vmem:[%s3566_s9 + $0xd8] sm:$0xff] }
 0x1ef   : > { %2556 = vrot.lane.b32.xlu0 %v2555_v23, %s2596_s23  ;;  %2413 = vmatprep.subr.bf16.mxu1 %v2412_v39  ;;  %v2582_v39 = vld [vmem:[#allocation2 + $0x10] ss:$8 sps:$4 sm:$0xff]  }
 0x1f1   : > { %2561 = vrot.lane.b32.xlu1 %v2560_v27, %s2595_s22  ;;  %2206 = vmatmul.mubr.msk.f32.gmra.mrb[20].mxu0 %vm473_vm0, %v651_v43  ;;  %v2450_v43 = vpack.c.bf16 %v1711_v31, %v1710_v30  ;;  %v1490_v30 = vld [vmem:[%s3566_s9 + $0x10] sm:$0xff]  ;;  %v1491_v31 = vld [vmem:[%s3566_s9 + $0x18] sm:$0xff] }
 0x1f2   : > { %2208 = vmatprep.mubr.msk.f32.mxu0 %vm2593_vm1, %v2591_v7  ;;  %v1713_v7 = vld [vmem:[%s3568_s11 + $0x18] sm:$0xff]  ;;  %v2418_v41 = vpack.c.bf16 %v1491_v31, %v1490_v30  ;;  %v1502_v31 = vld [vmem:[%s3566_s9 + $0x70] sm:$0xff] }
 0x1f3   : > { %v2454_v47 = vpack.c.bf16 %v1713_v7, %v1712_v40  ;;  %2451 = vmatprep.subr.bf16.mxu0 %v2450_v43 }
 0x1f4   : > { %2453 = vmatpush3.bf16.msra.mxu0 %v2450_v43 }
 0x1f5   : > { %2209 = vmatmul.mubr.msk.f32.gmra.mrb[22].mxu0 %vm473_vm0, %v654_v52  ;;  %v1714_v52 = vld [vmem:[%s3568_s11 + $0x20] sm:$0xff]  ;;  %2455 = vmatprep.subr.bf16.mxu0 %v2454_v47 }
 0x1f6   : > { %v2458_v34 = vpack.c.bf16 %v1715_v33, %v1714_v52  ;;  %v1509_v52 = vld [vmem:[%s3566_s9 + $0xa8] sm:$0xff] }
 0x1f8   : > { %2457 = vmatpush3.bf16.msra.mxu0 %v2454_v47  ;;  %v1508_v47 = vld [vmem:[%s3566_s9 + $0xa0] sm:$0xff] }
 0x1f9   : > { %2459 = vmatprep.subr.bf16.mxu0 %v2458_v34 }
 0x1fc   : > { %2461 = vmatpush3.bf16.msra.mxu0 %v2458_v34 }
 0x1fd   : > { %2463 = vmatprep.subr.bf16.mxu0 %v2462_v37 }
 0x200   : > { %2465 = vmatpush3.bf16.msra.mxu0 %v2462_v37 }
 0x201   : > { %2467 = vmatprep.subr.bf16.mxu0 %v2466_v42 }
 0x204   : > { %2469 = vmatpush3.bf16.msra.mxu0 %v2466_v42 }
 0x259   : > { %v2537_v44 = vpop.permute.xlu0 %2536 }
 0x25a   : > { %v2539_v46 = vunpack.i.h.bf16 %v2537_v44  ;;  %v2538_v48 = vunpack.i.l.bf16 %v2537_v44 }
 0x25b   : > { %v2547_v45 = vpop.permute.xlu1 %2546 }
 0x25c   : > { %v2549_v60 = vunpack.i.h.bf16 %v2547_v45  ;;  %v2548_v62 = vunpack.i.l.bf16 %v2547_v45  ;;  %v1275_v14 = vsel %vm473_vm0, %v2579_v49, %v2539_v46  ;;  %v1283_v19 = vsel %vm473_vm0, %v2580_v55, %v2538_v48  ;;  %v1492_v46 = vld [vmem:[%s3566_s9 + $0x20] sm:$0xff]  ;;  %v1493_v48 = vld [vmem:[%s3566_s9 + $0x28] sm:$0xff]  ;;  %v1510_v49 = vld [vmem:[%s3566_s9 + $0xb0] sm:$0xff] }
 0x25d   : > { %v2542_v54 = vpop.permute.xlu0 %2541  ;;  %v2420_v45 = vpack.c.bf16 %v1509_v52, %v1508_v47  ;;  %v2422_v55 = vpack.c.bf16 %v1493_v48, %v1492_v46  ;;  %v1691_v47 = vld [vmem:[%s3567_s10 + $0x8] sm:$0xff]  ;;  %v727_v52 = vld [vmem:[%s3561_s4] sm:$0x3]  ;;  %v1705_v46 = vld [vmem:[%s3567_s10 + $0x78] sm:$0xff] }
 0x25e   : > { %v2544_v63 = vunpack.i.h.bf16 %v2542_v54  ;;  %v2543_v5 = vunpack.i.l.bf16 %v2542_v54  ;;  %v1511_v54 = vld [vmem:[%s3566_s9 + $0xb8] sm:$0xff] }
 0x25f   : > { %v2552_v6 = vpop.permute.xlu1 %2551  ;;  %v2424_v56 = vpack.c.bf16 %v1511_v54, %v1510_v49  ;;  %v1706_v49 = vld [vmem:[%s3567_s10 + $0x80] sm:$0xff]  ;;  %v1707_v54 = vld [vmem:[%s3567_s10 + $0x88] sm:$0xff] }
 0x260   : > { %v2554_v15 = vunpack.i.h.bf16 %v2552_v6  ;;  %v2553_v16 = vunpack.i.l.bf16 %v2552_v6  ;;  %v1285_v21 = vsel %vm1277_vm5, %v1283_v19, %v2543_v5  ;;  %v1278_v23 = vsel %vm1277_vm5, %v1275_v14, %v2544_v63  ;;  %v1496_v5 = vld [vmem:[%s3566_s9 + $0x40] sm:$0xff]  ;;  %v1497_v6 = vld [vmem:[%s3566_s9 + $0x48] sm:$0xff]  ;;  %v1499_v19 = vld [vmem:[%s3566_s9 + $0x58] sm:$0xff] }
 0x261   : > { %v2557_v27 = vpop.permute.xlu0 %2556  ;;  %v1287_v28 = vsel %vm1280_vm6, %v1285_v21, %v2548_v62  ;;  %v1281_v29 = vsel %vm1280_vm6, %v1278_v23, %v2549_v60  ;;  %v1495_v60 = vld [vmem:[%s3566_s9 + $0x38] sm:$0xff]  ;;  %v1512_v62 = vld [vmem:[%s3566_s9 + $0xc0] sm:$0xff]  ;;  %v2430_v14 = vpack.c.bf16 %v1497_v6, %v1496_v5  ;;  %v1517_v23 = vld [vmem:[%s3566_s9 + $0xe8] sm:$0xff] }
 0x262   : > { %v2559_v40 = vunpack.i.h.bf16 %v2557_v27  ;;  %v2558_v43 = vunpack.i.l.bf16 %v2557_v27  ;;  %1400 = vmatprep.mubr.f32.mxu1 %v1287_v28  ;;  %v1284_v35 = vsel %vm473_vm0, %v2581_v26, %v2553_v16  ;;  %v1276_v36 = vsel %vm473_vm0, %v2582_v39, %v2554_v15  ;;  %v1498_v16 = vld [vmem:[%s3566_s9 + $0x50] sm:$0xff]  ;;  %v1516_v21 = vld [vmem:[%s3566_s9 + $0xe0] sm:$0xff]  ;;  %v1501_v28 = vld [vmem:[%s3566_s9 + $0x68] sm:$0xff] }
 0x263   : > { %v2562_v7 = vpop.permute.xlu1 %2561  ;;  %1401 = vmatmul.mubr.f32.vlgmr.msra.gmra.mrb[6].mxu1 %v1281_v29  ;;  %v2428_v63 = vpack.c.bf16 %v1513_v58, %v1512_v62  ;;  %v2432_v15 = vpack.c.bf16 %v1515_v12, %v1514_v10  ;;  %v2436_v26 = vpack.c.bf16 %v1517_v23, %v1516_v21  ;;  %v1500_v27 = vld [vmem:[%s3566_s9 + $0x60] sm:$0xff]  ;;  %v1518_v29 = vld [vmem:[%s3566_s9 + $0xf0] sm:$0xff] }
 0x264   : > { %v2564_v33 = vunpack.i.h.bf16 %v2562_v7  ;;  %v2563_v34 = vunpack.i.l.bf16 %v2562_v7  ;;  %2415 = vmatpush3.bf16.msra.mxu1 %v2414_v25  ;;  %v1286_v37 = vsel %vm1277_vm5, %v1284_v35, %v2558_v43  ;;  %v1279_v38 = vsel %vm1277_vm5, %v1276_v36, %v2559_v40  ;;  %v1503_v40 = vld [vmem:[%s3566_s9 + $0x78] sm:$0xff]  ;;  %v1690_v7 = vld [vmem:[%s3567_s10] sm:$0xff]  ;;  %v1724_v21 = vld [vmem:[%s3568_s11 + $0x70] sm:$0xff] }
 0x265   : > { %2417 = vmatprep.subr.bf16.mxu1 %v2416_v32  ;;  %v2434_v25 = vpack.c.bf16 %v1499_v19, %v1498_v16  ;;  %v1519_v32 = vld [vmem:[%s3566_s9 + $0xf8] sm:$0xff]  ;;  %v2438_v39 = vpack.c.bf16 %v1501_v28, %v1500_v27  ;;  %v2442_v43 = vpack.c.bf16 %v1503_v40, %v1502_v31  ;;  %v736_v36 = vrot.slane %v727_v52, %v464_v51  ;;  %v1722_v16 = vld [vmem:[%s3568_s11 + $0x60] sm:$0xff]  ;;  %v1723_v19 = vld [vmem:[%s3568_s11 + $0x68] sm:$0xff] }
 0x266   : > { %v1288_v42 = vsel %vm1280_vm6, %v1286_v37, %v2563_v34  ;;  %v1282_v44 = vsel %vm1280_vm6, %v1279_v38, %v2564_v33  ;;  %v2440_v30 = vpack.c.bf16 %v1519_v32, %v1518_v29  ;;  %v2483_v33 = vpack.c.bf16 %v1691_v47, %v1690_v7  ;;  %v1692_v34 = vld [vmem:[%s3567_s10 + $0x10] sm:$0xff]  ;;  %v1693_v35 = vld [vmem:[%s3567_s10 + $0x18] sm:$0xff]  ;;  %v1694_v38 = vld [vmem:[%s3567_s10 + $0x20] sm:$0xff] }
 0x267   : > { %1405 = vmatprep.mubr.f32.mxu1 %v1288_v42  ;;  %v2486_v37 = vpack.c.bf16 %v1693_v35, %v1692_v34  ;;  %v2513_v50 = vadd.f32 %v3227_v9, %v736_v36  ;;  %v1702_v9 = vld [vmem:[%s3567_s10 + $0x60] sm:$0xff]  ;;  %v1703_v42 = vld [vmem:[%s3567_s10 + $0x68] sm:$0xff]  ;;  %v2474_v23 = vpack.c.bf16 %v1723_v19, %v1722_v16 }
 0x268   : > { %1406 = vmatmul.mubr.f32.gmra.mrb[8].mxu1 %v1282_v44  ;;  %v2501_v44 = vpack.c.bf16 %v1703_v42, %v1702_v9 }
 0x269   : > { %2419 = vmatpush3.bf16.msra.mxu1 %v2418_v41  ;;  %1594 = vmatprep.mubr.f32.mxu1 %v647_v0  ;;  %v2426_v0 = vpack.c.bf16 %v1495_v60, %v1494_v57  ;;  %v1695_v41 = vld [vmem:[%s3567_s10 + $0x28] sm:$0xff]  ;;  %v1708_v57 = vld [vmem:[%s3567_s10 + $0x90] sm:$0xff]  ;;  %v1709_v60 = vld [vmem:[%s3567_s10 + $0x98] sm:$0xff] }
 0x26a   : > { %2421 = vmatprep.subr.bf16.mxu1 %v2420_v45  ;;  %v2489_v51 = vpack.c.bf16 %v1695_v41, %v1694_v38  ;;  %v1704_v45 = vld [vmem:[%s3567_s10 + $0x70] sm:$0xff]  ;;  %v2510_v62 = vpack.c.bf16 %v1709_v60, %v1708_v57 }
 0x26b   : > { %v2504_v48 = vpack.c.bf16 %v1705_v46, %v1704_v45 }
 0x26d   : > { %2423 = vmatpush3.bf16.msra.mxu1 %v2422_v55  ;;  %v2507_v55 = vpack.c.bf16 %v1707_v54, %v1706_v49 }
 0x26e   : > { %2425 = vmatprep.subr.bf16.mxu1 %v2424_v56  ;;  %v732_v56 = vrot.slane %v727_v52, %v3047_v53 }
 0x270   : > { %v2512_v58 = vadd.f32 %v3225_v8, %v732_v56  ;;  %v2514_v5 = vadd.f32 %v3232_v13, %v732_v56  ;;  %v1720_v8 = vld [vmem:[%s3568_s11 + $0x50] sm:$0xff] }
 0x271   : > { %2427 = vmatpush3.bf16.msra.mxu1 %v2426_v0  ;;  %v2515_v0 = vadd.f32 %v3234_v18, %v736_v36 }
 0x272   : > { %2429 = vmatprep.subr.bf16.mxu1 %v2428_v63  ;;  %v926_v63 = vmax.f32 %v2512_v58, 0.0  ;;  %v928_v10 = vmax.f32 %v2514_v5, 0.0 }
 0x273   : > { %v929_v6 = vmax.f32 %v2515_v0, 0.0 }
 0x275   : > { %2431 = vmatpush3.bf16.msra.mxu1 %v2430_v14 }
 0x276   : > { %2433 = vmatprep.subr.bf16.mxu1 %v2432_v15 }
 0x279   : > { %2435 = vmatpush3.bf16.msra.mxu1 %v2434_v25  ;;  %v1725_v25 = vld [vmem:[%s3568_s11 + $0x78] sm:$0xff] }
 0x27a   : > { %2437 = vmatprep.subr.bf16.mxu1 %v2436_v26  ;;  %v2478_v27 = vpack.c.bf16 %v1725_v25, %v1724_v21 }
 0x27d   : > { %2439 = vmatpush3.bf16.msra.mxu1 %v2438_v39 }
 0x27e   : > { %2441 = vmatprep.subr.bf16.mxu1 %v2440_v30  ;;  %v1984_v30 = vld [vmem:[%s3565_s8] ss:$0 sm:$0xff] }
 0x281   : > { %2443 = vmatpush3.bf16.msra.mxu1 %v2442_v43 }
 0x282   : > { %2482 = vmatprep.subr.bf16.mxu1 %v2592_v17 }
 0x284   : > { %1595 = vmatmul.mubr.f32.vlgmr.msra.gmra.mrb[10].mxu1 %v646_v2  ;;  %v927_v2 = vmax.f32 %v2513_v50, 0.0 }
 0x285   : > { %1599 = vmatprep.mubr.f32.mxu1 %v650_v4  ;;  %2484 = vmatpush1.bf16.msra.mxu1 %v2483_v33  ;;  %v1699_v4 = vld [vmem:[%s3567_s10 + $0x48] sm:$0xff] }
 0x286   : > { %2485 = vmatprep.subr.bf16.mxu1 %v2592_v17 }
 0x288   : > { %1600 = vmatmul.mubr.f32.gmra.mrb[12].mxu1 %v649_v3  ;;  %v1698_v3 = vld [vmem:[%s3567_s10 + $0x40] sm:$0xff] }
 0x289   : > { %1604 = vmatprep.mubr.f32.mxu1 %v653_v24  ;;  %2487 = vmatpush1.bf16.msra.mxu1 %v2486_v37  ;;  %v2495_v20 = vpack.c.bf16 %v1699_v4, %v1698_v3 }
 0x28a   : > { %2488 = vmatprep.subr.bf16.mxu1 %v2592_v17 }
 0x28c   : > { %1605 = vmatmul.mubr.f32.gmra.mrb[14].mxu1 %v652_v22  ;;  %v1701_v22 = vld [vmem:[%s3567_s10 + $0x58] sm:$0xff] }
 0x28d   : > { %2490 = vmatpush1.bf16.msra.mxu1 %v2489_v51  ;;  %1990 = vmatprep.mubr.msk.f32.mxu1 %vm473_vm0, %v927_v2  ;;  %v2498_v24 = vpack.c.bf16 %v1701_v22, %v1700_v11 }
 0x28e   : > { %2491 = vmatprep.subr.bf16.mxu1 %v2592_v17 }
 0x291   : > { %2493 = vmatpush1.bf16.msra.mxu1 %v2492_v61 }
 0x292   : > { %2494 = vmatprep.subr.bf16.mxu1 %v2592_v17 }
 0x295   : > { %2496 = vmatpush1.bf16.msra.mxu1 %v2495_v20 }
 0x296   : > { %2497 = vmatprep.subr.bf16.mxu1 %v2592_v17 }
 0x299   : > { %2499 = vmatpush1.bf16.msra.mxu1 %v2498_v24 }
 0x29a   : > { %2500 = vmatprep.subr.bf16.mxu1 %v2592_v17 }
 0x29d   : > { %2502 = vmatpush1.bf16.msra.mxu1 %v2501_v44 }
 0x29e   : > { %2503 = vmatprep.subr.bf16.mxu1 %v2592_v17 }
 0x2a1   : > { %2505 = vmatpush1.bf16.msra.mxu1 %v2504_v48  ;;  %v1883_v48 = vld [vmem:[%s3569_s12] sm:$0x1] }
 0x2a2   : > { %2506 = vmatprep.subr.bf16.mxu1 %v2592_v17  ;;  %v1901_v54 = vrot.slane %v1883_v48, %v3047_v53 }
 0x2a5   : > { %2508 = vmatpush1.bf16.msra.mxu1 %v2507_v55 }
 0x2a6   : > { %2509 = vmatprep.subr.bf16.mxu1 %v2592_v17  ;;  %v1721_v17 = vld [vmem:[%s3568_s11 + $0x58] sm:$0xff] }
 0x2a7   : > { %v2470_v18 = vpack.c.bf16 %v1721_v17, %v1720_v8 }
 0x2a9   : > { %2511 = vmatpush1.bf16.msra.mxu1 %v2510_v62  ;;  %2471 = vmatprep.subr.bf16.mxu0 %v2470_v18 }
 0x2aa   : > { %2473 = vmatpush3.bf16.msra.mxu0 %v2470_v18 }
 0x2ab   : > { %2475 = vmatprep.subr.bf16.mxu0 %v2474_v23 }
 0x2ac   : > { %1872 = vmatmul.mubr.f32.vlgmr.msra.gmra.mrb[16].mxu1 %v926_v63 }
 0x2ad   : > { %1991 = vmatprep.mubr.msk.f32.mxu1 %vm473_vm0, %v929_v6 }
 0x2ae   : > { %2477 = vmatpush3.bf16.msra.mxu0 %v2474_v23 }
 0x2af   : > { %2479 = vmatprep.subr.bf16.mxu0 %v2478_v27 }
 0x2b0   : > { %1877 = vmatmul.mubr.f32.gmra.mrb[18].mxu1 %v928_v10 }
 0x2b2   : > { %2481 = vmatpush3.bf16.msra.mxu0 %v2478_v27 }
 0x2b8   : > { %v2193_v12 = vpop.f32.mrb[16].mxu0 }
 0x2b9   : > { %v1477_v14 = vpop.f32.mrb[17].mxu0 }
 0x2c0   : > { %v1676_v13 = vpop.f32.mrb[18].mxu0 }
 0x2c1   : > { %v2204_v15 = vpop.f32.mrb[19].mxu0 }
 0x2c4   : > { %v1681_v26 = vpop.f32.mrb[20].mxu0 }
 0x2c5   : > { %v2207_v28 = vpop.f32.mrb[21].mxu0 }
 0x2c8   : > { %v1686_v29 = vpop.f32.mrb[22].mxu0 }
 0x2c9   : > { %v2210_v32 = vpop.f32.mrb[23].mxu0 }
 0x336   : > { %v2077_v39 = vpop.f32.mrb[6].mxu1 }
 0x337   : > { %v2078_v31 = vpop.f32.mrb[7].mxu1 }
 0x338   : > { %v2079_v40 = vadd.f32 %v2078_v31, %v2077_v39 }
 0x33a   : > { %v1403_v43 = vadd.f32 %v2079_v40, %v1984_v30 }
 0x33b   : > { %v2080_v7 = vpop.f32.mrb[8].mxu1 }
 0x33c   : > { %v2081_v47 = vpop.f32.mrb[9].mxu1  ;;  %v1478_v33 = vadd.f32 %v1477_v14, %v1403_v43 }
 0x33d   : > { %v2082_v52 = vadd.f32 %v2081_v47, %v2080_v7 }
 0x33e   : > { %v1486_v35 = vmax.f32 %v1478_v33, 0.0 }
 0x33f   : > { %v1408_v34 = vadd.f32 %v2082_v52, %v1984_v30 }
 0x340   : > { %2243 = vmatprep.mubr.f32.mxu0 %v1486_v35 }
 0x341   : > { %v1483_v36 = vadd.f32 %v2193_v12, %v1408_v34 }
 0x343   : > { %v1487_v37 = vmax.f32 %v1483_v36, 0.0 }
 0x345   : > { %2244 = vmatmul.mubr.f32.vlgmr.msra.gmra.mrb[24].mxu0 %v1487_v37 }
 0x357   : > { %v2121_v38 = vpop.f32.mrb[10].mxu1 }
 0x358   : > { %v2122_v41 = vpop.f32.mrb[11].mxu1 }
 0x359   : > { %v2123_v50 = vadd.f32 %v2122_v41, %v2121_v38 }
 0x35b   : > { %v1677_v51 = vadd.f32 %v2123_v50, %v1676_v13  ;;  %v2124_v59 = vpop.f32.mrb[12].mxu1 }
 0x35c   : > { %v2125_v1 = vpop.f32.mrb[13].mxu1 }
 0x35d   : > { %v2126_v2 = vadd.f32 %v2125_v1, %v2124_v59  ;;  %v1882_v56 = vmul.f32 2.0, %v1677_v51 }
 0x35f   : > { %v1682_v61 = vadd.f32 %v2126_v2, %v1681_v26  ;;  %v2127_v3 = vpop.f32.mrb[14].mxu1  ;;  %v1884_v5 = vadd.f32 %v1883_v48, %v1882_v56 }
 0x360   : > { %v2128_v4 = vpop.f32.mrb[15].mxu1 }
 0x361   : > { %v2129_v20 = vadd.f32 %v2128_v4, %v2127_v3 }
 0x363   : > { %v1687_v11 = vadd.f32 %v2129_v20, %v1686_v29 }
 0x37f   : > { %v1873_v22 = vpop.f32.mrb[16].mxu1 }
 0x380   : > { %v1875_v24 = vpop.f32.mrb[17].mxu1 }
 0x383   : > { %v1878_v9 = vpop.f32.mrb[18].mxu1 }
 0x384   : > { %v1880_v42 = vpop.f32.mrb[19].mxu1 }
 0x418   : > { %v2245_v44 = vpop.f32.mrb[24].mxu0 }
 0x419   : > { %v1879_v45 = vadd.f32 %v2245_v44, %v1878_v9  ;;  %v1792_v46 = vpop.f32.mrb[25].mxu0 }
 0x41a   : > { %v1874_v49 = vadd.f32 %v1873_v22, %v1792_v46 }
 0x41b   : > { %v1889_v55 = vrot.slane %v1879_v45, 7 }
 0x41c   : > { %v1888_v57 = vrot.slane %v1874_v49, 7 }
 0x41d   : > { %v1896_v60 = vadd.f32 %v1889_v55, %v1687_v11 }
 0x41e   : > { %v1890_v62 = vsel %vm1887_vm7, %v1888_v57, %v1889_v55  ;;  %v1894_v58 = vadd.f32 %v1888_v57, %v1677_v51 }
 0x41f   : > { %v1905_v0 = vadd.f32 %v1901_v54, %v1896_v60  ;;  %v1895_v63 = vadd.f32 %v1890_v62, %v1682_v61 }
 0x420   : > { %v1903_v6 = vadd.f32 %v1901_v54, %v1894_v58 }
 0x421   : > { %1910 = vst.msk [vmem:[%s440_s24 + $0x10] sm:$0x1] %vm1909_vm8, %v1905_v0  ;;  %v1904_v10 = vadd.f32 %v1901_v54, %v1895_v63 }
 0x422   : > { %v1906_v53 = vsel %vm1887_vm7, %v1884_v5, %v1903_v6 }
 0x423   : > { %1907 = vst.msk [vmem:[%s440_s24] sm:$0xff] %vm473_vm0, %v1906_v53  ;;  %1908 = vst.msk [vmem:[%s440_s24 + $0x8] sm:$0xff] %vm473_vm0, %v1904_v10 }
 0x424 PF: > { %s23_s25 = sadd.s32 1, %s2589_s25  }
 0x425   : > { %p20_p4 = scmp.ge.s32.totalorder %s23_s25, 4  }
 0x427   :  { %22 = sbr.rel (!%p20_p4) target bundleno = 1 (0x1), region = 104 }

</bundles_post_ra>
